<compile_context>
chip_gen: v5e
topology: v5e:2x2
jax: 0.10.0
libtpu: 0.0.40
codegen_flags: <defaults>
</compile_context>

<pallas_src>
import numpy as np
import jax
import jax.numpy as jnp
from jax.experimental import pallas as pl
from jax.experimental.pallas import tpu as pltpu

# dtype fed to the MXU; accumulation is always f32 via preferred_element_type.
MXU_DTYPE = jnp.bfloat16


def _make_swin_attention_kernel(num_head, WT, S, C, use_mask):
    """One grid step == `WT` windows of one image, rows already flattened."""
    hd = C // num_head
    M = WT * S                 # matmul rows per step
    B = num_head * WT          # attention batch (head-major, then window)

    def body(x_ref, wqkv_ref, bqkv_ref, wproj_ref, bproj_ref, rel_ref,
             mask_ref, o_ref):
        # x_ref: (M, C) bf16 -- WT windows of the current image, pre-flattened
        # in the wrapper, so no in-kernel input reshape is needed.
        x2 = x_ref[...]

        # Single fused QKV projection.  Softmax scale is pre-folded into the
        # q columns of wqkv/bqkv on the host -> no per-element scaling here.
        qkv = jnp.dot(x2, wqkv_ref[...],
                      preferred_element_type=jnp.float32) + bqkv_ref[...]   # (M, 3C) f32

        # Head relayout: head-major batch (B, S, hd).  hd-wide lane slices +
        # one leading-axis concat per tensor (see header for why not a
        # transpose / 2-batch-dim dot_general).
        def split_heads(off):
            parts = [qkv[:, off + h * hd: off + (h + 1) * hd].reshape(WT, S, hd)
                     for h in range(num_head)]
            return jnp.concatenate(parts, axis=0).astype(MXU_DTYPE)         # (B, S, hd)

        q = split_heads(0)
        k = split_heads(C)
        v = split_heads(2 * C)

        # Batched attention scores (single batch dim -> one batched vmatmul).
        scores = jnp.einsum('bqd,bkd->bqk', q, k,
                            preferred_element_type=jnp.float32)             # (B, S, S) f32

        # Broadcast-add the (small) rel-pos bias and shift mask instead of a
        # materialized (num_head*NWIN, S, S) table.
        scores = scores.reshape(num_head, WT, S, S)
        scores = scores + rel_ref[...][:, None, :, :]                        # per head
        if use_mask:
            scores = scores + mask_ref[...][None, :, :, :]                   # per window
        scores = scores.reshape(B, S, S)

        # Softmax in f32; reciprocal goes to the (otherwise idle) EUP slot.
        scores = scores - jnp.max(scores, axis=-1, keepdims=True)
        e = jnp.exp(scores)
        probs = e * pl.reciprocal(jnp.sum(e, axis=-1, keepdims=True), approx=True)

        pv = jnp.einsum('bqk,bkd->bqd', probs.astype(MXU_DTYPE), v,
                        preferred_element_type=jnp.float32)                  # (B, S, hd) f32

        # One-time head merge back into the lane dim (single lane concat),
        # then ONE full-K (M, C) @ (C, C) output projection.
        pv_mc = jnp.concatenate(
            [pv[h * WT:(h + 1) * WT].reshape(M, hd) for h in range(num_head)],
            axis=-1)                                                         # (M, C) f32
        out = jnp.dot(pv_mc.astype(MXU_DTYPE), wproj_ref[...],
                      preferred_element_type=jnp.float32) + bproj_ref[...]   # (M, C) f32

        o_ref[...] = out

    if use_mask:
        return body

    def body_nomask(x_ref, wqkv_ref, bqkv_ref, wproj_ref, bproj_ref, rel_ref, o_ref):
        return body(x_ref, wqkv_ref, bqkv_ref, wproj_ref, bproj_ref, rel_ref,
                    None, o_ref)
    return body_nomask


def _pick_windows_per_block(NWIN, S, target_rows=1024):
    """Window-tile size: multiple of 8 (so the (WT*S, C) block stays legal on
    the (8,128) tiling) with >= ~target_rows matmul rows, else all windows."""
    wt = 8
    while wt < NWIN:
        if NWIN % wt == 0 and wt * S >= target_rows:
            return wt
        wt *= 2
    return NWIN


def window_attention_pallas(xw, wqkv_t, bqkv, wproj_t, bproj, rel_bias, mask,
                            num_head, windows_per_block=None):
    """xw: (N, NWIN, S, C) bf16 windows.  Returns (N, NWIN, S, C) f32."""
    N, NWIN, S, C = xw.shape
    if windows_per_block is None:
        windows_per_block = _pick_windows_per_block(NWIN, S)
    WT = windows_per_block
    assert NWIN % WT == 0 and (WT == NWIN or (WT * S) % 8 == 0), (NWIN, WT, S)
    num_tiles = NWIN // WT
    use_mask = mask is not None

    kernel = _make_swin_attention_kernel(num_head, WT, S, C, use_mask)

    # Input/output are passed row-flattened (N, NWIN*S, C) so the kernel block
    # is exactly the (M, C) matmul operand (no in-kernel reshape either way).
    x_flat = xw.reshape(N, NWIN * S, C)

    in_specs = [
        pl.BlockSpec((None, WT * S, C), lambda i, j: (i, j, 0)),      # activations
        pl.BlockSpec((C, 3 * C), lambda i, j: (0, 0)),                # qkv weight (pre-T, q-scaled, bf16)
        pl.BlockSpec((1, 3 * C), lambda i, j: (0, 0)),                # qkv bias   (q-scaled, f32)
        pl.BlockSpec((C, C), lambda i, j: (0, 0)),                    # proj weight (pre-T, bf16)
        pl.BlockSpec((1, C), lambda i, j: (0, 0)),                    # proj bias  (f32)
        pl.BlockSpec((num_head, S, S), lambda i, j: (0, 0, 0)),       # rel-pos bias (per head)
    ]
    args = [x_flat, wqkv_t, bqkv, wproj_t, bproj, rel_bias]
    if use_mask:
        in_specs.append(pl.BlockSpec((WT, S, S), lambda i, j: (j, 0, 0)))  # shift mask (per window)
        args.append(mask)

    out = pl.pallas_call(
        kernel,
        out_shape=jax.ShapeDtypeStruct((N, NWIN * S, C), jnp.float32),
        grid=(N, num_tiles),
        in_specs=in_specs,
        out_specs=pl.BlockSpec((None, WT * S, C), lambda i, j: (i, j, 0)),
        compiler_params=pltpu.CompilerParams(
            dimension_semantics=("parallel", "parallel"),   # images x window tiles
            vmem_limit_bytes=48 * 1024 * 1024),
    )(*args)
    return out.reshape(N, NWIN, S, C)


def _build_shift_mask(pad_H, pad_W, window_size, shift_size):
    """Static host-side shift mask, (num_windows, S, S) float32."""
    w0, w1 = window_size
    nH, nW = pad_H // w0, pad_W // w1
    NWIN, S = nH * nW, w0 * w1
    m = np.zeros((pad_H, pad_W), dtype=np.float32)
    h_slices = ((0, pad_H - w0), (pad_H - w0, pad_H - shift_size[0]),
                (pad_H - shift_size[0], pad_H))
    w_slices = ((0, pad_W - w1), (pad_W - w1, pad_W - shift_size[1]),
                (pad_W - shift_size[1], pad_W))
    cnt = 0
    for hs in h_slices:
        for ws in w_slices:
            m[hs[0]:hs[1], ws[0]:ws[1]] = cnt
            cnt += 1
    m = m.reshape(nH, w0, nW, w1).transpose(0, 2, 1, 3).reshape(NWIN, S)
    diff = m[:, :, None] - m[:, None, :]
    return np.where(diff != 0, -100.0, 0.0).astype(np.float32)


def make_relative_pos_bias(window_size, num_head, key):
    w0, w1 = window_size
    table_rows = (2 * w0 - 1) * 2 * w1 - 1          # reference's formula, kept verbatim
    table = 0.02 * jax.random.truncated_normal(
        key, -2.0, 2.0, (table_rows, num_head), jnp.float32)
    coords = np.stack(np.meshgrid(np.arange(w0), np.arange(w1), indexing='ij'))
    cf = coords.reshape(2, -1)
    rel = (cf[:, :, None] - cf[:, None, :]).transpose(1, 2, 0).astype(np.int64)
    rel[:, :, 0] += w0 - 1
    rel[:, :, 1] += w0 - 1                          # reference uses window_size[0] twice
    rel[:, :, 0] *= 2 * w0 - 1
    index = rel.sum(-1).reshape(-1)
    S = w0 * w1
    bias = table[jnp.asarray(index)].reshape(S, S, num_head)
    return jnp.transpose(bias, (2, 1, 0))           # (num_head, S, S) == permute(2, 1, 0)


def shifted_window_attn_forward(x, emb_dim, window_size, shift_size, num_head,
                                rel_bias, wqkv, bqkv, wproj, bproj,
                                windows_per_block=None):
    N, H, W, C = x.shape
    w0, w1 = window_size
    pad_r = (w0 - H % w0) % w0          # reference quirk: both pads derived from H
    pad_b = (w1 - H % w1) % w1
    x = jnp.pad(x, ((0, 0), (0, pad_b), (0, pad_r), (0, 0)))
    _, pad_H, pad_W, _ = x.shape

    shift_size = list(shift_size)
    if w0 >= pad_H:
        shift_size[0] = 0
    if w1 >= pad_W:
        shift_size[1] = 0
    shifted = sum(shift_size) > 0
    if shifted:
        x = jnp.roll(x, (-shift_size[0], -shift_size[1]), axis=(1, 2))

    nH, nW = pad_H // w0, pad_W // w1
    NWIN, S, hd = nH * nW, w0 * w1, C // num_head
    scale = float(hd) ** -0.5

    # Window partition (one fused XLA transpose) + bf16 cast for MXU/DMA.
    xw = x.reshape(N, nH, w0, nW, w1, C).transpose(0, 1, 3, 2, 4, 5)
    xw = xw.reshape(N, NWIN, S, C).astype(MXU_DTYPE)

    # Shift mask only exists (and is only passed) when the layer is shifted.
    mask = (jnp.asarray(_build_shift_mask(pad_H, pad_W, (w0, w1), shift_size))
            if shifted else None)

    # Pre-transpose weights, fold the softmax scale into the q columns/bias,
    # cast MXU operands to bf16 once on the host.
    wqkv_t = jnp.transpose(wqkv)                                    # (C, 3C)
    wqkv_t = jnp.concatenate([wqkv_t[:, :C] * scale, wqkv_t[:, C:]], axis=1)
    bqkv_s = jnp.concatenate([bqkv[:C] * scale, bqkv[C:]]).reshape(1, 3 * C)
    wproj_t = jnp.transpose(wproj)                                  # (C, C)

    out = window_attention_pallas(
        xw,
        wqkv_t.astype(MXU_DTYPE), bqkv_s.astype(jnp.float32),
        wproj_t.astype(MXU_DTYPE), bproj.reshape(1, C).astype(jnp.float32),
        rel_bias.astype(jnp.float32), mask, num_head,
        windows_per_block=windows_per_block)

    # Window un-partition + inverse shift + crop.
    xo = out.reshape(N, nH, nW, w0, w1, C).transpose(0, 1, 3, 2, 4, 5)
    xo = xo.reshape(N, pad_H, pad_W, C)
    if shifted:
        xo = jnp.roll(xo, (shift_size[0], shift_size[1]), axis=(1, 2))
    return xo[:, :H, :W, :]


def _reference_forward(x, window_size, shift_size, num_head, rel_bias,
                       wqkv, bqkv, wproj, bproj):
    """Pure-JAX f32 mirror of the PyTorch reference (eval mode, dropout p=0)."""
    N, H, W, C = x.shape
    w0, w1 = window_size
    pad_r = (w0 - H % w0) % w0
    pad_b = (w1 - H % w1) % w1
    x = jnp.pad(x, ((0, 0), (0, pad_b), (0, pad_r), (0, 0)))
    _, pad_H, pad_W, _ = x.shape
    shift_size = list(shift_size)
    if w0 >= pad_H:
        shift_size[0] = 0
    if w1 >= pad_W:
        shift_size[1] = 0
    shifted = sum(shift_size) > 0
    if shifted:
        x = jnp.roll(x, (-shift_size[0], -shift_size[1]), axis=(1, 2))
    nH, nW = pad_H // w0, pad_W // w1
    NWIN, S, hd = nH * nW, w0 * w1, C // num_head
    xw = x.reshape(N, nH, w0, nW, w1, C).transpose(0, 1, 3, 2, 4, 5)
    xw = xw.reshape(N * NWIN, S, C)
    qkv = xw @ wqkv.T + bqkv
    qkv = qkv.reshape(N * NWIN, S, 3, num_head, hd).transpose(2, 0, 3, 1, 4)
    q, k, v = qkv[0] * (hd ** -0.5), qkv[1], qkv[2]
    attn = q @ jnp.swapaxes(k, -1, -2) + rel_bias[None]
    if shifted:
        mask = jnp.asarray(_build_shift_mask(pad_H, pad_W, (w0, w1), shift_size))
        attn = attn.reshape(N, NWIN, num_head, S, S) + mask[None, :, None, :, :]
        attn = attn.reshape(N * NWIN, num_head, S, S)
    attn = jax.nn.softmax(attn, axis=-1)
    out = jnp.swapaxes(attn @ v, 1, 2).reshape(N * NWIN, S, C)
    out = out @ wproj.T + bproj
    out = out.reshape(N, nH, nW, w0, w1, C).transpose(0, 1, 3, 2, 4, 5)
    out = out.reshape(N, pad_H, pad_W, C)
    if shifted:
        out = jnp.roll(out, (shift_size[0], shift_size[1]), axis=(1, 2))
    return out[:, :H, :W, :]


if __name__ == "__main__":
    key = jax.random.PRNGKey(0)
    k1, k2, k3, k4, k5, k6 = jax.random.split(key, 6)

    N, H, W = 2, 8, 8
    emb_dim = 32
    num_head = 4
    window_size = (4, 4)
    shift_size = (2, 2)
    # dropout = attention_dropout = 0.0 -> identity (eval-mode behaviour)

    x = jax.random.normal(k1, (N, H, W, emb_dim), jnp.float32)
    wqkv = 0.02 * jax.random.normal(k2, (3 * emb_dim, emb_dim), jnp.float32)
    bqkv = 0.02 * jax.random.normal(k3, (3 * emb_dim,), jnp.float32)
    wproj = 0.02 * jax.random.normal(k4, (emb_dim, emb_dim), jnp.float32)
    bproj = 0.02 * jax.random.normal(k5, (emb_dim,), jnp.float32)
    rel_bias = make_relative_pos_bias(window_size, num_head, k6)

    out = shifted_window_attn_forward(
        x, emb_dim, window_size, shift_size, num_head,
        rel_bias, wqkv, bqkv, wproj, bproj)
    out = jax.block_until_ready(out)
    assert out.shape == (N, H, W, emb_dim) and out.dtype == jnp.float32

    ref = jax.block_until_ready(_reference_forward(
        x, window_size, shift_size, num_head, rel_bias, wqkv, bqkv, wproj, bproj))
    max_err = float(jnp.max(jnp.abs(out - ref)))
    assert max_err < 1e-2, f"mismatch vs reference: max |diff| = {max_err}"

    print("KERNEL_OK")
</pallas_src>

<mosaic_0001>
module attributes {stable_mosaic.version = 11 : i64} {
  func.func @body(%arg0: i32, %arg1: i32, %arg2: memref<1x64x32xbf16, #tpu.memory_space<vmem>>, %arg3: memref<32x96xbf16, #tpu.memory_space<vmem>>, %arg4: memref<1x96xf32, #tpu.memory_space<vmem>>, %arg5: memref<32x32xbf16, #tpu.memory_space<vmem>>, %arg6: memref<1x32xf32, #tpu.memory_space<vmem>>, %arg7: memref<4x16x16xf32, #tpu.memory_space<vmem>>, %arg8: memref<4x16x16xf32, #tpu.memory_space<vmem>>, %arg9: memref<1x64x32xf32, #tpu.memory_space<vmem>>) attributes {dimension_semantics = [#tpu.dimension_semantics<parallel>, #tpu.dimension_semantics<parallel>], iteration_bounds = array<i64: 2, 1>, scalar_prefetch = 0 : i64, scratch_operands = 0 : i64, tpu.core_type = #tpu.core_type<tc>, window_params = [{transform_indices = @transform_0, window_bounds = array<i64: 1, 64, 32>}, {pipeline_mode = #tpu.pipeline_mode<synchronous>, transform_indices = @transform_1, window_bounds = array<i64: 32, 96>}, {pipeline_mode = #tpu.pipeline_mode<synchronous>, transform_indices = @transform_2, window_bounds = array<i64: 1, 96>}, {pipeline_mode = #tpu.pipeline_mode<synchronous>, transform_indices = @transform_3, window_bounds = array<i64: 32, 32>}, {pipeline_mode = #tpu.pipeline_mode<synchronous>, transform_indices = @transform_4, window_bounds = array<i64: 1, 32>}, {pipeline_mode = #tpu.pipeline_mode<synchronous>, transform_indices = @transform_5, window_bounds = array<i64: 4, 16, 16>}, {transform_indices = @transform_6, window_bounds = array<i64: 4, 16, 16>}, {transform_indices = @transform_7, window_bounds = array<i64: 1, 64, 32>}]} {
    %c0 = arith.constant 0 : index
    %c0_0 = arith.constant 0 : index
    %c0_1 = arith.constant 0 : index
    %0 = vector.load %arg2[%c0, %c0_0, %c0_1] : memref<1x64x32xbf16, #tpu.memory_space<vmem>>, vector<1x64x32xbf16>
    %1 = vector.shape_cast %0 : vector<1x64x32xbf16> to vector<64x32xbf16>
    %c0_2 = arith.constant 0 : index
    %c0_3 = arith.constant 0 : index
    %2 = vector.load %arg3[%c0_2, %c0_3] : memref<32x96xbf16, #tpu.memory_space<vmem>>, vector<32x96xbf16>
    %cst = arith.constant dense<0.000000e+00> : vector<64x96xf32>
    %3 = tpu.matmul %1, %2, %cst {dimension_numbers = #tpu.dot_dimension_numbers<[1], [0], [0], [1], [0, 0, 1, 1], [], []>} : vector<64x32xbf16>, vector<32x96xbf16>, vector<64x96xf32> -> vector<64x96xf32>
    %c0_4 = arith.constant 0 : index
    %c0_5 = arith.constant 0 : index
    %4 = vector.load %arg4[%c0_4, %c0_5] : memref<1x96xf32, #tpu.memory_space<vmem>>, vector<1x96xf32>
    %5 = vector.broadcast %4 : vector<1x96xf32> to vector<64x96xf32>
    %6 = arith.addf %3, %5 : vector<64x96xf32>
    %7 = vector.extract_strided_slice %6 {offsets = [0, 0], sizes = [64, 8], strides = [1, 1]} : vector<64x96xf32> to vector<64x8xf32>
    %8 = vector.shape_cast %7 : vector<64x8xf32> to vector<4x16x8xf32>
    %9 = vector.extract_strided_slice %6 {offsets = [0, 8], sizes = [64, 8], strides = [1, 1]} : vector<64x96xf32> to vector<64x8xf32>
    %10 = vector.shape_cast %9 : vector<64x8xf32> to vector<4x16x8xf32>
    %11 = vector.extract_strided_slice %6 {offsets = [0, 16], sizes = [64, 8], strides = [1, 1]} : vector<64x96xf32> to vector<64x8xf32>
    %12 = vector.shape_cast %11 : vector<64x8xf32> to vector<4x16x8xf32>
    %13 = vector.extract_strided_slice %6 {offsets = [0, 24], sizes = [64, 8], strides = [1, 1]} : vector<64x96xf32> to vector<64x8xf32>
    %14 = vector.shape_cast %13 : vector<64x8xf32> to vector<4x16x8xf32>
    %15 = tpu.concatenate %8, %10, %12, %14 in 0 : vector<4x16x8xf32>, vector<4x16x8xf32>, vector<4x16x8xf32>, vector<4x16x8xf32> -> vector<16x16x8xf32>
    %16 = arith.truncf %15 : vector<16x16x8xf32> to vector<16x16x8xbf16>
    %17 = vector.extract_strided_slice %6 {offsets = [0, 32], sizes = [64, 8], strides = [1, 1]} : vector<64x96xf32> to vector<64x8xf32>
    %18 = vector.shape_cast %17 : vector<64x8xf32> to vector<4x16x8xf32>
    %19 = vector.extract_strided_slice %6 {offsets = [0, 40], sizes = [64, 8], strides = [1, 1]} : vector<64x96xf32> to vector<64x8xf32>
    %20 = vector.shape_cast %19 : vector<64x8xf32> to vector<4x16x8xf32>
    %21 = vector.extract_strided_slice %6 {offsets = [0, 48], sizes = [64, 8], strides = [1, 1]} : vector<64x96xf32> to vector<64x8xf32>
    %22 = vector.shape_cast %21 : vector<64x8xf32> to vector<4x16x8xf32>
    %23 = vector.extract_strided_slice %6 {offsets = [0, 56], sizes = [64, 8], strides = [1, 1]} : vector<64x96xf32> to vector<64x8xf32>
    %24 = vector.shape_cast %23 : vector<64x8xf32> to vector<4x16x8xf32>
    %25 = tpu.concatenate %18, %20, %22, %24 in 0 : vector<4x16x8xf32>, vector<4x16x8xf32>, vector<4x16x8xf32>, vector<4x16x8xf32> -> vector<16x16x8xf32>
    %26 = arith.truncf %25 : vector<16x16x8xf32> to vector<16x16x8xbf16>
    %27 = vector.extract_strided_slice %6 {offsets = [0, 64], sizes = [64, 8], strides = [1, 1]} : vector<64x96xf32> to vector<64x8xf32>
    %28 = vector.shape_cast %27 : vector<64x8xf32> to vector<4x16x8xf32>
    %29 = vector.extract_strided_slice %6 {offsets = [0, 72], sizes = [64, 8], strides = [1, 1]} : vector<64x96xf32> to vector<64x8xf32>
    %30 = vector.shape_cast %29 : vector<64x8xf32> to vector<4x16x8xf32>
    %31 = vector.extract_strided_slice %6 {offsets = [0, 80], sizes = [64, 8], strides = [1, 1]} : vector<64x96xf32> to vector<64x8xf32>
    %32 = vector.shape_cast %31 : vector<64x8xf32> to vector<4x16x8xf32>
    %33 = vector.extract_strided_slice %6 {offsets = [0, 88], sizes = [64, 8], strides = [1, 1]} : vector<64x96xf32> to vector<64x8xf32>
    %34 = vector.shape_cast %33 : vector<64x8xf32> to vector<4x16x8xf32>
    %35 = tpu.concatenate %28, %30, %32, %34 in 0 : vector<4x16x8xf32>, vector<4x16x8xf32>, vector<4x16x8xf32>, vector<4x16x8xf32> -> vector<16x16x8xf32>
    %36 = arith.truncf %35 : vector<16x16x8xf32> to vector<16x16x8xbf16>
    "tpu.trace_start"() <{level = 10 : i32, message = "bqd,bkd->bqk"}> : () -> ()
    %cst_6 = arith.constant dense<0.000000e+00> : vector<16x16x16xf32>
    %37 = tpu.matmul %16, %26, %cst_6 {dimension_numbers = #tpu.dot_dimension_numbers<[2], [2], [1], [1], [0, 0, 0, 1, 1, 1], [0], [0]>} : vector<16x16x8xbf16>, vector<16x16x8xbf16>, vector<16x16x16xf32> -> vector<16x16x16xf32>
    "tpu.trace_stop"() : () -> ()
    %38 = vector.shape_cast %37 : vector<16x16x16xf32> to vector<4x4x16x16xf32>
    %c0_7 = arith.constant 0 : index
    %c0_8 = arith.constant 0 : index
    %c0_9 = arith.constant 0 : index
    %39 = vector.load %arg7[%c0_7, %c0_8, %c0_9] : memref<4x16x16xf32, #tpu.memory_space<vmem>>, vector<4x16x16xf32>
    %40 = vector.shape_cast %39 : vector<4x16x16xf32> to vector<4x1x16x16xf32>
    %41 = vector.broadcast %40 : vector<4x1x16x16xf32> to vector<4x4x16x16xf32>
    %42 = arith.addf %38, %41 : vector<4x4x16x16xf32>
    %c0_10 = arith.constant 0 : index
    %c0_11 = arith.constant 0 : index
    %c0_12 = arith.constant 0 : index
    %43 = vector.load %arg8[%c0_10, %c0_11, %c0_12] : memref<4x16x16xf32, #tpu.memory_space<vmem>>, vector<4x16x16xf32>
    %44 = vector.shape_cast %43 : vector<4x16x16xf32> to vector<1x4x16x16xf32>
    %45 = vector.broadcast %44 : vector<1x4x16x16xf32> to vector<4x4x16x16xf32>
    %46 = arith.addf %42, %45 : vector<4x4x16x16xf32>
    %47 = vector.shape_cast %46 : vector<4x4x16x16xf32> to vector<16x16x16xf32>
    %cst_13 = arith.constant dense<0xFF800000> : vector<16x16xf32>
    %48 = vector.multi_reduction <maximumf>, %47, %cst_13 [2] : vector<16x16x16xf32> to vector<16x16xf32>
    %49 = vector.shape_cast %48 : vector<16x16xf32> to vector<16x16x1xf32>
    %50 = vector.broadcast %49 : vector<16x16x1xf32> to vector<16x16x16xf32>
    %51 = arith.subf %47, %50 : vector<16x16x16xf32>
    %52 = math.exp %51 : vector<16x16x16xf32>
    %cst_14 = arith.constant dense<0.000000e+00> : vector<16x16xf32>
    %53 = vector.multi_reduction <add>, %52, %cst_14 [2] : vector<16x16x16xf32> to vector<16x16xf32>
    %54 = vector.shape_cast %53 : vector<16x16xf32> to vector<16x16x1xf32>
    %55 = tpu.reciprocal %54 {approx = true} : vector<16x16x1xf32> -> vector<16x16x1xf32>
    %56 = vector.broadcast %55 : vector<16x16x1xf32> to vector<16x16x16xf32>
    %57 = arith.mulf %52, %56 : vector<16x16x16xf32>
    %58 = arith.truncf %57 : vector<16x16x16xf32> to vector<16x16x16xbf16>
    "tpu.trace_start"() <{level = 10 : i32, message = "bqk,bkd->bqd"}> : () -> ()
    %cst_15 = arith.constant dense<0.000000e+00> : vector<16x16x8xf32>
    %59 = tpu.matmul %58, %36, %cst_15 {dimension_numbers = #tpu.dot_dimension_numbers<[2], [1], [1], [2], [0, 0, 0, 1, 1, 2], [0], [0]>} : vector<16x16x16xbf16>, vector<16x16x8xbf16>, vector<16x16x8xf32> -> vector<16x16x8xf32>
    "tpu.trace_stop"() : () -> ()
    %60 = vector.extract_strided_slice %59 {offsets = [0, 0, 0], sizes = [4, 16, 8], strides = [1, 1, 1]} : vector<16x16x8xf32> to vector<4x16x8xf32>
    %61 = vector.shape_cast %60 : vector<4x16x8xf32> to vector<64x8xf32>
    %62 = vector.extract_strided_slice %59 {offsets = [4, 0, 0], sizes = [4, 16, 8], strides = [1, 1, 1]} : vector<16x16x8xf32> to vector<4x16x8xf32>
    %63 = vector.shape_cast %62 : vector<4x16x8xf32> to vector<64x8xf32>
    %64 = vector.extract_strided_slice %59 {offsets = [8, 0, 0], sizes = [4, 16, 8], strides = [1, 1, 1]} : vector<16x16x8xf32> to vector<4x16x8xf32>
    %65 = vector.shape_cast %64 : vector<4x16x8xf32> to vector<64x8xf32>
    %66 = vector.extract_strided_slice %59 {offsets = [12, 0, 0], sizes = [4, 16, 8], strides = [1, 1, 1]} : vector<16x16x8xf32> to vector<4x16x8xf32>
    %67 = vector.shape_cast %66 : vector<4x16x8xf32> to vector<64x8xf32>
    %68 = tpu.concatenate %61, %63, %65, %67 in 1 : vector<64x8xf32>, vector<64x8xf32>, vector<64x8xf32>, vector<64x8xf32> -> vector<64x32xf32>
    %69 = arith.truncf %68 : vector<64x32xf32> to vector<64x32xbf16>
    %c0_16 = arith.constant 0 : index
    %c0_17 = arith.constant 0 : index
    %70 = vector.load %arg5[%c0_16, %c0_17] : memref<32x32xbf16, #tpu.memory_space<vmem>>, vector<32x32xbf16>
    %cst_18 = arith.constant dense<0.000000e+00> : vector<64x32xf32>
    %71 = tpu.matmul %69, %70, %cst_18 {dimension_numbers = #tpu.dot_dimension_numbers<[1], [0], [0], [1], [0, 0, 1, 1], [], []>} : vector<64x32xbf16>, vector<32x32xbf16>, vector<64x32xf32> -> vector<64x32xf32>
    %c0_19 = arith.constant 0 : index
    %c0_20 = arith.constant 0 : index
    %72 = vector.load %arg6[%c0_19, %c0_20] : memref<1x32xf32, #tpu.memory_space<vmem>>, vector<1x32xf32>
    %73 = vector.broadcast %72 : vector<1x32xf32> to vector<64x32xf32>
    %74 = arith.addf %71, %73 : vector<64x32xf32>
    %c0_21 = arith.constant 0 : index
    %c0_22 = arith.constant 0 : index
    %c0_23 = arith.constant 0 : index
    %75 = vector.load %arg9[%c0_21, %c0_22, %c0_23] : memref<1x64x32xf32, #tpu.memory_space<vmem>>, vector<1x64x32xf32>
    %76 = vector.shape_cast %75 : vector<1x64x32xf32> to vector<64x32xf32>
    %77 = vector.shape_cast %74 : vector<64x32xf32> to vector<1x64x32xf32>
    tpu.vector_store %arg9[%c0_21, %c0_22, %c0_23], %77 {strides = array<i32>} : memref<1x64x32xf32, #tpu.memory_space<vmem>>, vector<1x64x32xf32>,
    return
  }
  func.func @transform_0(%arg0: i32, %arg1: i32) -> (i32, i32, i32) {
    %c0_i32 = arith.constant 0 : i32
    %c0_i32_0 = arith.constant 0 : i32
    return %arg0, %arg1, %c0_i32 : i32, i32, i32
  }
  func.func @transform_1(%arg0: i32, %arg1: i32) -> (i32, i32) {
    %c0_i32 = arith.constant 0 : i32
    %c0_i32_0 = arith.constant 0 : i32
    %c0_i32_1 = arith.constant 0 : i32
    return %c0_i32, %c0_i32_0 : i32, i32
  }
  func.func @transform_2(%arg0: i32, %arg1: i32) -> (i32, i32) {
    %c0_i32 = arith.constant 0 : i32
    %c0_i32_0 = arith.constant 0 : i32
    %c0_i32_1 = arith.constant 0 : i32
    return %c0_i32, %c0_i32_0 : i32, i32
  }
  func.func @transform_3(%arg0: i32, %arg1: i32) -> (i32, i32) {
    %c0_i32 = arith.constant 0 : i32
    %c0_i32_0 = arith.constant 0 : i32
    %c0_i32_1 = arith.constant 0 : i32
    return %c0_i32, %c0_i32_0 : i32, i32
  }
  func.func @transform_4(%arg0: i32, %arg1: i32) -> (i32, i32) {
    %c0_i32 = arith.constant 0 : i32
    %c0_i32_0 = arith.constant 0 : i32
    %c0_i32_1 = arith.constant 0 : i32
    return %c0_i32, %c0_i32_0 : i32, i32
  }
  func.func @transform_5(%arg0: i32, %arg1: i32) -> (i32, i32, i32) {
    %c0_i32 = arith.constant 0 : i32
    %c0_i32_0 = arith.constant 0 : i32
    %c0_i32_1 = arith.constant 0 : i32
    %c0_i32_2 = arith.constant 0 : i32
    return %c0_i32, %c0_i32_0, %c0_i32_1 : i32, i32, i32
  }
  func.func @transform_6(%arg0: i32, %arg1: i32) -> (i32, i32, i32) {
    %c0_i32 = arith.constant 0 : i32
    %c0_i32_0 = arith.constant 0 : i32
    %c0_i32_1 = arith.constant 0 : i32
    return %arg1, %c0_i32, %c0_i32_0 : i32, i32, i32
  }
  func.func @transform_7(%arg0: i32, %arg1: i32) -> (i32, i32, i32) {
    %c0_i32 = arith.constant 0 : i32
    %c0_i32_0 = arith.constant 0 : i32
    return %arg0, %arg1, %c0_i32 : i32, i32, i32
  }
}

</mosaic_0001>

<bundles_post_ra>
// kernel: tpu_custom_call.1
= control target key start
LH: loop header
LB: loop body
LE: loop exit
PB: predicated region body
PF: predicated region fallthrough
CT: control target
= control target key end

     0   :  { %12 = vsyncpa [#allocation3], 0  ;;  %s2646_s24 = smov 0   ;;  %s2648_s25 = smov 0   ;;  %s3417_s0 = inlined_call_operand.vmem [shape: bf16[2,64,32], index: 0, kind: input, shape index: {}]   ;;  %s3418_s1 = inlined_call_operand.vmem [shape: bf16[32,96], index: 1, kind: input, shape index: {}]   ;;  %s3419_s2 = inlined_call_operand.vmem [shape: f32[1,96], index: 2, kind: input, shape index: {}]   ;;  %s3420_s3 = inlined_call_operand.vmem [shape: bf16[32,32], index: 3, kind: input, shape index: {}]   ;;  %s3421_s4 = inlined_call_operand.vmem [shape: f32[1,32], index: 4, kind: input, shape index: {}]   ;;  %s3422_s5 = inlined_call_operand.vmem [shape: f32[4,16,16], index: 5, kind: input, shape index: {}]   ;;  %s3423_s6 = inlined_call_operand.hbm [shape: f32[4,16,16], index: 6, kind: input, shape index: {}]   ;;  %s3424_s7 = inlined_call_operand.vmem [shape: f32[2,64,32], index: 7, kind: output, shape index: {}]  }
   0x1   :  { %s2650_s26 = smov 0  }
   0x2 LB: > { %s2141_s27 = sadd.s32 4294967295, %s2593_s26   ;;  %s30_s28 = sadd.s32 1, %s2589_s25  ;;  %s2593_s26 = sphi %s2650_s26, %s18_s26   ;;  %s2589_s25 = sphi %s2648_s25, %s3426_s25   ;;  %s2585_s24 = sphi %s2646_s24, %s3425_s24  }
   0x3   : > { %p32_p0 = scmp.ge.s32.totalorder %s30_s28, 2  ;;  %p2143_p1 = scmp.ge.s32.totalorder %s2593_s26, 1 }
   0x4   : > { %p222_p2 = scmp.lt.s32.totalorder %s2593_s26, 3  ;;  %p2250_p4 = scmp.eq.s32.totalorder %s2141_s27, 0 }
   0x5   : > { %s3428_s28 = smov (%p32_p0, %s30_s28), 0  ;;  %s252_s8 = sshll.u32 %s3423_s6, 4  ;;  %s253_s8 = int_to_ptr.hbm [resolvable:$true] %s252_s8 }
   0x6   : > { %p223_p3 = pnand %p2143_p1, %p222_p2  ;;  %s2595_s9 = smov [#allocation2]  }
   0x7   : > { %s254_s10 = sshll.u32 %s2595_s9, 4  ;;  %s2596_s11 = smov 128   ;;  %s255_s10 = int_to_ptr.vmem [resolvable:$true] %s254_s10 }
   0x8   : > { %p2246_p5 = pneg %p223_p3  ;;  %s2597_s12 = smov 8  }
   0x9   : > { %283 = sbr.rel (%p223_p3) target bundleno = 1417 (0x589), region = 48 }
   0xa   : > { %p2247_p6 = pnand %p2250_p4, %p2246_p5 }
   0xc   : > { %2249 = dma.hbm_to_vmem [thread:$0]  (!%p2247_p6), %s253_s8, 1024, %s255_s10, [#allocation3], %s2596_s11, %s2596_s11, %s2597_s12  }
   0xe   : > { %2580 = dma.done.wait (%p2250_p4), [#allocation3], 1024  }
   0xf   : > { %2582 = vsyncadd (%p2250_p4), [#allocation3], 4294966272  ;;  %p325_p7 = scmp.lt.s32.totalorder %s2585_s24, 1  ;;  %v2233_v0 = vld [vmem:[%s3418_s1 + $0x8] sm:$0xff]  ;;  %v2232_v1 = vld [vmem:[%s3418_s1] sm:$0xff]  ;;  %vm394_vm0 = vcmask 261120  }
  0x10   : > { %413 = vmatpush.bf16.msra.mxu0 %v2233_v0  ;;  %2236 = vmatpush.bf16.msra.mxu1 %v2233_v0  ;;  %v2407_v8 = vld [vmem:[%s3419_s2] ss:$0 sm:$0xff]  ;;  %s2598_s23 = smov 112   ;;  %s2599_s27 = smov 120   ;;  %vm555_vm1 = vcmask 64512   ;;  %vm1061_vm2 = vcmask 130048  }
  0x11   : > { %s3430_s24 = smov (!%p325_p7, %s2585_s24), 1  ;;  %2238 = vmatpush.bf16.msra.mxu3 %v2233_v0  ;;  %2237 = vmatpush.bf16.msra.mxu2 %v2233_v0  ;;  %s2600_s29 = smov 96   ;;  %vm1958_vm3 = vcmask 195584  }
  0x12   : > { %s2226_s13 = sshll.u32 %s3430_s24, 5  ;;  %s2601_s30 = smov 104  }
  0x13   : > { %s332_s20 = scalar_lea.vmem %s3417_s0, %s2226_s13  ;;  %s2602_s8 = smov 64  }
  0x14   : > { %v2228_v2 = vld [vmem:[%s332_s20] sm:$0xff]  ;;  %v2229_v3 = vld [vmem:[%s332_s20 + $0x8] sm:$0xff]  ;;  %414 = vmatpush.bf16.msra.mxu0 %v2232_v1  ;;  %2239 = vmatpush.bf16.msra.mxu1 %v2232_v1  ;;  %v2231_v4 = vld [vmem:[%s332_s20 + $0x18] sm:$0xff]  ;;  %s2227_s13 = sshll.u32 %s3430_s24, 6 }
  0x15   : > { %v2230_v5 = vld [vmem:[%s332_s20 + $0x10] sm:$0xff]  ;;  %2241 = vmatpush.bf16.msra.mxu3 %v2232_v1  ;;  %2240 = vmatpush.bf16.msra.mxu2 %v2232_v1  ;;  %s343_s18 = scalar_lea.vmem %s3424_s7, %s2227_s13 }
  0x17   : > { %2176 = vmatmul.msk.bf16.vlgmr.msra.gmra.mxu0 %vm394_vm0, %v2228_v2  ;;  %2177 = vmatmul.msk.bf16.vlgmr.msra.gmra.mxu1 %vm394_vm0, %v2229_v3 }
  0x18   : > { %2179 = vmatmul.msk.bf16.vlgmr.msra.gmra.mxu3 %vm394_vm0, %v2231_v4  ;;  %2178 = vmatmul.msk.bf16.vlgmr.msra.gmra.mxu2 %vm394_vm0, %v2230_v5 }
  0x94   : > { %v416_v6 = vpop.f32.mrf.mxu0  ;;  %v421_v7 = vpop.f32.mrf.mxu1 }
  0x95   : > { %v417_v13 = vadd.f32 %v2407_v8, %v416_v6  ;;  %v422_v14 = vadd.f32 %v2407_v8, %v421_v7 }
  0x97   : > { %v518_v25 = vpack.c.bf16 %v422_v14, %v422_v14  ;;  %v516_v34 = vpack.c.bf16 %v417_v13, %v417_v13 }
  0x99   : > { %v578_v35 = vunpack.c.l.b16 %v518_v25  ;;  %v550_v39 = vunpack.c.l.b16 %v516_v34 }
  0x9b   : > { %v431_v9 = vpop.f32.mrf.mxu3  ;;  %v426_v10 = vpop.f32.mrf.mxu2 }
  0x9c   : > { %v418_v11 = vpop.f32.mrf.mxu0  ;;  %v423_v12 = vpop.f32.mrf.mxu1  ;;  %v432_v19 = vadd.f32 %v2407_v8, %v431_v9  ;;  %v427_v20 = vadd.f32 %v2407_v8, %v426_v10 }
  0x9d   : > { %v419_v15 = vadd.f32 %v2407_v8, %v418_v11  ;;  %v424_v16 = vadd.f32 %v2407_v8, %v423_v12 }
  0x9e   : > { %v520_v26 = vpack.c.bf16 %v427_v20, %v427_v20  ;;  %v522_v42 = vpack.c.bf16 %v432_v19, %v432_v19 }
  0x9f   : > { %v2297_v17 = vpack.i.bf16 %v419_v15, %v417_v13  ;;  %v2688_v18 = vpack.i.bf16 %v424_v16, %v422_v14  ;;  %v519_v29 = vpack.c.bf16 %v424_v16, %v424_v16  ;;  %v517_v31 = vpack.c.bf16 %v419_v15, %v419_v15 }
  0xa0   : > { %v605_v32 = vunpack.c.l.b16 %v520_v26  ;;  %v632_v44 = vunpack.c.l.b16 %v522_v42 }
  0xa1   : > { %2298 = vrot.lane.b32.xlu1 %v2297_v17, %s2598_s23  ;;  %2288 = vrot.lane.b32.xlu0 %v2297_v17, %s2599_s27  ;;  %v579_v36 = vunpack.c.l.b16 %v519_v29  ;;  %v551_v37 = vunpack.c.l.b16 %v517_v31 }
  0xa3   : > { %v433_v21 = vpop.f32.mrf.mxu3  ;;  %v428_v22 = vpop.f32.mrf.mxu2  ;;  %v2696_v40 = vpack.c.b16 %v579_v36, %v578_v35  ;;  %v2698_v41 = vpack.c.b16 %v551_v37, %v550_v39 }
  0xa4   : > { %v434_v23 = vadd.f32 %v2407_v8, %v433_v21  ;;  %v429_v24 = vadd.f32 %v2407_v8, %v428_v22 }
  0xa6   : > { %v2690_v27 = vpack.i.bf16 %v434_v23, %v432_v19  ;;  %v2302_v28 = vpack.i.bf16 %v429_v24, %v427_v20  ;;  %v521_v30 = vpack.c.bf16 %v429_v24, %v429_v24  ;;  %v523_v43 = vpack.c.bf16 %v434_v23, %v434_v23 }
  0xa8   : > { %2308 = vrot.lane.b32.xlu2 %v2690_v27, %s2599_s27  ;;  %v606_v33 = vunpack.c.l.b16 %v521_v30  ;;  %v633_v45 = vunpack.c.l.b16 %v523_v43 }
  0xa9   : > { %2303 = vrot.lane.b32.xlu1 %v2302_v28, %s2599_s27  ;;  %2293 = vrot.lane.b32.xlu0 %v2688_v18, %s2599_s27 }
  0xaa   : > { %v2694_v38 = vpack.c.b16 %v606_v33, %v605_v32  ;;  %v2710_v46 = vpack.c.b16 %v633_v45, %v632_v44 }
  0xb0   : > { %581 = vrot.lane.b32.xlu2 %v2696_v40, %s2600_s29 }
  0xb1   : > { %608 = vrot.lane.b32.xlu0 %v2694_v38, %s2600_s29  ;;  %553 = vrot.lane.b32.xlu1 %v2698_v41, %s2600_s29 }
  0xb8   : > { %2313 = vrot.lane.b32.xlu2 %v2688_v18, %s2598_s23 }
  0xb9   : > { %2318 = vrot.lane.b32.xlu0 %v2297_v17, %s2601_s30  ;;  %2323 = vrot.lane.b32.xlu1 %v2302_v28, %s2598_s23 }
  0xc1   : > { %635 = vrot.lane.b32.xlu1 %v2710_v46, %s2600_s29 }
  0xc9   : > { %2338 = vrot.lane.b32.xlu1 %v2302_v28, %s2601_s30 }
 0x102   : > { %v2309_v47 = vpop.permute.xlu2 %2308 }
 0x103   : > { %v2311_v48 = vunpack.i.h.bf16 %v2309_v47  ;;  %v2310_v49 = vunpack.i.l.bf16 %v2309_v47 }
 0x105   : > { %v531_v50 = vpack.c.bf16 %v2311_v48, %v2311_v48  ;;  %v530_v51 = vpack.c.bf16 %v2310_v49, %v2310_v49 }
 0x107   : > { %v741_v52 = vunpack.c.l.b16 %v531_v50  ;;  %v740_v53 = vunpack.c.l.b16 %v530_v51 }
 0x109   : > { %v2715_v54 = vpack.c.b16 %v741_v52, %v740_v53 }
 0x10a   : > { %v582_v55 = vpop.permute.xlu2 %581 }
 0x10b   : > { %v587_v56 = vsel %vm555_vm1, %v582_v55, 0  ;;  %743 = vrot.lane.b32.xlu1 %v2715_v54, %s2600_s29 }
 0x10c   : > { %596 = vmatpush.bf16.xpose.msrb.mxu2 %v587_v56 }
 0x112   : > { %v2314_v26 = vpop.permute.xlu2 %2313 }
 0x113   : > { %2181 = vmatmul.msk.bf16.vlgmr.msrb.gmra.mxu2 %vm555_vm1, %v2696_v40  ;;  %v2299_v57 = vpop.permute.xlu1 %2298  ;;  %v2289_v58 = vpop.permute.xlu0 %2288  ;;  %v2316_v36 = vunpack.i.h.bf16 %v2314_v26  ;;  %v2315_v37 = vunpack.i.l.bf16 %v2314_v26 }
 0x114   : > { %v2291_v59 = vunpack.i.h.bf16 %v2289_v58  ;;  %v2290_v60 = vunpack.i.l.bf16 %v2289_v58  ;;  %v2301_v8 = vunpack.i.h.bf16 %v2299_v57  ;;  %v2300_v9 = vunpack.i.l.bf16 %v2299_v57 }
 0x115   : > { %v535_v49 = vpack.c.bf16 %v2316_v36, %v2316_v36  ;;  %v534_v50 = vpack.c.bf16 %v2315_v37, %v2315_v37 }
 0x116   : > { %v525_v61 = vpack.c.bf16 %v2291_v59, %v2291_v59  ;;  %v524_v62 = vpack.c.bf16 %v2290_v60, %v2290_v60  ;;  %v533_v13 = vpack.c.bf16 %v2301_v8, %v2301_v8  ;;  %v532_v14 = vpack.c.bf16 %v2300_v9, %v2300_v9 }
 0x117   : > { %v795_v57 = vunpack.c.l.b16 %v535_v49  ;;  %v794_v58 = vunpack.c.l.b16 %v534_v50 }
 0x118   : > { %v660_v63 = vunpack.c.l.b16 %v525_v61  ;;  %v659_v0 = vunpack.c.l.b16 %v524_v62  ;;  %v768_v22 = vunpack.c.l.b16 %v533_v13  ;;  %v767_v23 = vunpack.c.l.b16 %v532_v14 }
 0x119   : > { %v2757_v60 = vpack.c.b16 %v795_v57, %v794_v58 }
 0x11a   : > { %v2722_v1 = vpack.c.b16 %v660_v63, %v659_v0  ;;  %v2734_v30 = vpack.c.b16 %v768_v22, %v767_v23 }
 0x11b   : > { %v2304_v2 = vpop.permute.xlu1 %2303  ;;  %v2294_v3 = vpop.permute.xlu0 %2293 }
 0x11c   : > { %v2296_v4 = vunpack.i.h.bf16 %v2294_v3  ;;  %v2295_v5 = vunpack.i.l.bf16 %v2294_v3  ;;  %662 = vrot.lane.b32.xlu2 %v2722_v1, %s2600_s29  ;;  %v2306_v17 = vunpack.i.h.bf16 %v2304_v2  ;;  %v2305_v19 = vunpack.i.l.bf16 %v2304_v2 }
 0x11e   : > { %v527_v6 = vpack.c.bf16 %v2296_v4, %v2296_v4  ;;  %v526_v7 = vpack.c.bf16 %v2295_v5, %v2295_v5  ;;  %v529_v24 = vpack.c.bf16 %v2306_v17, %v2306_v17  ;;  %v528_v25 = vpack.c.bf16 %v2305_v19, %v2305_v19 }
 0x120   : > { %v687_v10 = vunpack.c.l.b16 %v527_v6  ;;  %v686_v11 = vunpack.c.l.b16 %v526_v7  ;;  %v714_v31 = vunpack.c.l.b16 %v529_v24  ;;  %v713_v32 = vunpack.c.l.b16 %v528_v25 }
 0x122   : > { %v2726_v12 = vpack.c.b16 %v687_v10, %v686_v11  ;;  %v2744_v45 = vpack.c.b16 %v714_v31, %v713_v32 }
 0x123   : > { %v609_v15 = vpop.permute.xlu0 %608  ;;  %v554_v16 = vpop.permute.xlu1 %553 }
 0x124   : > { %689 = vrot.lane.b32.xlu0 %v2726_v12, %s2600_s29  ;;  %2328 = vrot.lane.b32.xlu2 %v2688_v18, %s2601_s30  ;;  %v560_v20 = vsel %vm555_vm1, %v554_v16, 0  ;;  %v614_v21 = vsel %vm555_vm1, %v609_v15, 0 }
 0x125   : > { %569 = vmatpush.bf16.xpose.msrb.mxu1 %v560_v20  ;;  %623 = vmatpush.bf16.xpose.msrb.mxu3 %v614_v21 }
 0x12b   : > { %v2319_v28 = vpop.permute.xlu0 %2318  ;;  %v2324_v29 = vpop.permute.xlu1 %2323 }
 0x12c   : > { %v2321_v33 = vunpack.i.h.bf16 %v2319_v28  ;;  %v2320_v34 = vunpack.i.l.bf16 %v2319_v28  ;;  %2182 = vmatmul.msk.bf16.vlgmr.msrb.gmra.mxu3 %vm555_vm1, %v2694_v38  ;;  %2333 = vrot.lane.b32.xlu0 %v2690_v27, %s2598_s23  ;;  %v2326_v18 = vunpack.i.h.bf16 %v2324_v29  ;;  %v2325_v35 = vunpack.i.l.bf16 %v2324_v29 }
 0x12d   : > { %770 = vrot.lane.b32.xlu2 %v2734_v30, %s2600_s29  ;;  %2180 = vmatmul.msk.bf16.vlgmr.msrb.gmra.mxu1 %vm555_vm1, %v2698_v41 }
 0x12e   : > { %v541_v39 = vpack.c.bf16 %v2321_v33, %v2321_v33  ;;  %v540_v42 = vpack.c.bf16 %v2320_v34, %v2320_v34  ;;  %v537_v47 = vpack.c.bf16 %v2326_v18, %v2326_v18  ;;  %v536_v48 = vpack.c.bf16 %v2325_v35, %v2325_v35 }
 0x130   : > { %v876_v43 = vunpack.c.l.b16 %v541_v39  ;;  %v875_v44 = vunpack.c.l.b16 %v540_v42  ;;  %v822_v55 = vunpack.c.l.b16 %v537_v47  ;;  %v821_v56 = vunpack.c.l.b16 %v536_v48 }
 0x132   : > { %v2746_v51 = vpack.c.b16 %v876_v43, %v875_v44  ;;  %v2755_v59 = vpack.c.b16 %v822_v55, %v821_v56  ;;  %v2831_v56 = vld [vmem:[#allocation2 + $0x8] sm:$0xff] }
 0x133   : > { %v636_v52 = vpop.permute.xlu1 %635 }
 0x134   : > { %v641_v53 = vsel %vm555_vm1, %v636_v52, 0  ;;  %716 = vrot.lane.b32.xlu0 %v2744_v45, %s2600_s29  ;;  %878 = vrot.lane.b32.xlu1 %v2746_v51, %s2600_s29 }
 0x135   : > { %2343 = vrot.lane.b32.xlu2 %v2690_v27, %s2601_s30  ;;  %650 = vmatpush.bf16.xpose.msra.mxu1 %v641_v53  ;;  %v982_v53 = vld [vmem:[%s3422_s5 + $0x8] sm:$0xff]  ;;  %s2604_s30 = smov 16  }
 0x13b   : > { %v2339_v61 = vpop.permute.xlu1 %2338 }
 0x13c   : > { %797 = vrot.lane.b32.xlu0 %v2757_v60, %s2600_s29  ;;  %1451 = vrot.lane.b32.xlu1 %v2698_v41, %s2602_s8  ;;  %v2341_v27 = vunpack.i.h.bf16 %v2339_v61  ;;  %v2340_v62 = vunpack.i.l.bf16 %v2339_v61  ;;  %v2840_v61 = vld [vmem:[#allocation2 + $0x18] sm:$0xff] }
 0x13d   : > { %2183 = vmatmul.msk.bf16.vlgmr.msra.gmra.mxu1 %vm555_vm1, %v2710_v46  ;;  %824 = vrot.lane.b32.xlu2 %v2755_v59, %s2600_s29 }
 0x13e   : > { %v545_v63 = vpack.c.bf16 %v2341_v27, %v2341_v27  ;;  %v544_v0 = vpack.c.bf16 %v2340_v62, %v2340_v62 }
 0x140   : > { %v930_v2 = vunpack.c.l.b16 %v545_v63  ;;  %v929_v3 = vunpack.c.l.b16 %v544_v0  ;;  %v981_v63 = vld [vmem:[%s3422_s5] sm:$0xff] }
 0x142   : > { %v2771_v4 = vpack.c.b16 %v930_v2, %v929_v3  ;;  %v2852_v2 = vld [vmem:[#allocation2 + $0x10] sm:$0xff] }
 0x144   : > { %1501 = vrot.lane.b32.xlu1 %v2694_v38, %s2602_s8 }
 0x145   : > { %1551 = vrot.lane.b32.xlu2 %v2722_v1, %s2602_s8 }
 0x14d   : > { %932 = vrot.lane.b32.xlu2 %v2771_v4, %s2600_s29 }
 0x155   : > { %1576 = vrot.lane.b32.xlu2 %v2726_v12, %s2602_s8 }
 0x15d   : > { %1526 = vrot.lane.b32.xlu2 %v2710_v46, %s2602_s8 }
 0x165   : > { %1751 = vrot.lane.b32.xlu2 %v2746_v51, %s2602_s8 }
 0x16d   : > { %1626 = vrot.lane.b32.xlu2 %v2715_v54, %s2602_s8 }
 0x176   : > { %v663_v38 = vpop.permute.xlu2 %662 }
 0x177   : > { %v668_v41 = vsel %vm555_vm1, %v663_v38, 0 }
 0x178   : > { %677 = vmatpush.bf16.xpose.msra.mxu2 %v668_v41 }
 0x17d   : > { %v744_v5 = vpop.permute.xlu1 %743 }
 0x17e   : > { %v2329_v6 = vpop.permute.xlu2 %2328  ;;  %v749_v7 = vsel %vm555_vm1, %v744_v5, 0 }
 0x17f   : > { %v2331_v8 = vunpack.i.h.bf16 %v2329_v6  ;;  %v2330_v9 = vunpack.i.l.bf16 %v2329_v6  ;;  %2184 = vmatmul.msk.bf16.vlgmr.msra.gmra.mxu2 %vm555_vm1, %v2722_v1  ;;  %v2859_v6 = vld [vmem:[#allocation2 + $0x20] sm:$0xff] }
 0x180   : > { %758 = vmatpush.bf16.xpose.msrb.mxu2 %v749_v7 }
 0x181   : > { %v543_v46 = vpack.c.bf16 %v2331_v8, %v2331_v8  ;;  %v542_v10 = vpack.c.bf16 %v2330_v9, %v2330_v9 }
 0x183   : > { %v903_v11 = vunpack.c.l.b16 %v543_v46  ;;  %v902_v13 = vunpack.c.l.b16 %v542_v10  ;;  %v2866_v10 = vld [vmem:[#allocation2] sm:$0xff] }
 0x185   : > { %v2787_v14 = vpack.c.b16 %v903_v11, %v902_v13  ;;  %v2868_v11 = vld [vmem:[#allocation2 + $0x30] sm:$0xff] }
 0x187   : > { %v771_v15 = vpop.permute.xlu2 %770  ;;  %905 = vrot.lane.b32.xlu0 %v2787_v14, %s2600_s29 }
 0x188   : > { %v776_v28 = vsel %vm555_vm1, %v771_v15, 0 }
 0x18f   : > { %v2344_v16 = vpop.permute.xlu2 %2343  ;;  %1476 = vrot.lane.b32.xlu0 %v2696_v40, %s2602_s8  ;;  %2187 = vmatmul.msk.bf16.vlgmr.msrb.gmra.mxu2 %vm555_vm1, %v2715_v54 }
 0x190   : > { %v2346_v17 = vunpack.i.h.bf16 %v2344_v16  ;;  %v2345_v1 = vunpack.i.l.bf16 %v2344_v16 }
 0x192   : > { %v547_v19 = vpack.c.bf16 %v2346_v17, %v2346_v17  ;;  %v546_v20 = vpack.c.bf16 %v2345_v1, %v2345_v1 }
 0x194   : > { %v957_v21 = vunpack.c.l.b16 %v547_v19  ;;  %v956_v22 = vunpack.c.l.b16 %v546_v20  ;;  %v2880_v20 = vld [vmem:[#allocation2 + $0x28] sm:$0xff] }
 0x196   : > { %v690_v23 = vpop.permute.xlu0 %689  ;;  %v2795_v24 = vpack.c.b16 %v957_v21, %v956_v22  ;;  %v598_v47 = vpop.f32.mrf.mxu2 }
 0x197   : > { %v695_v25 = vsel %vm555_vm1, %v690_v23, 0  ;;  %v825_v26 = vpop.permute.xlu2 %824  ;;  %v991_v0 = vadd.f32 %v981_v63, %v598_v47 }
 0x198   : > { %v830_v29 = vsel %vm555_vm1, %v825_v26, 0  ;;  %959 = vrot.lane.b32.xlu0 %v2795_v24, %s2600_s29  ;;  %704 = vmatpush.bf16.xpose.msra.mxu3 %v695_v25  ;;  %v2887_v26 = vld [vmem:[#allocation2 + $0x38] sm:$0xff] }
 0x199   : > { %839 = vmatpush.bf16.xpose.msra.mxu2 %v830_v29  ;;  %v2855_v3 = vadd.f32 %v2852_v2, %v991_v0 }
 0x19b   : > { %v1068_v5 = vsel %vm1061_vm2, %v2855_v3, -inf }
 0x19e   : > { %v2334_v40 = vpop.permute.xlu0 %2333  ;;  %v600_v57 = vpop.f32.mrf.mxu2 }
 0x19f   : > { %v2336_v54 = vunpack.i.h.bf16 %v2334_v40  ;;  %v2335_v31 = vunpack.i.l.bf16 %v2334_v40  ;;  %v1552_v32 = vpop.permute.xlu2 %1551  ;;  %2185 = vmatmul.msk.bf16.vlgmr.msra.gmra.mxu3 %vm555_vm1, %v2726_v12 }
 0x1a0   : > { %785 = vmatpush.bf16.xpose.msrb.mxu3 %v776_v28  ;;  %1601 = vrot.lane.b32.xlu0 %v2744_v45, %s2602_s8 }
 0x1a1   : > { %2190 = vmatmul.msk.bf16.vlgmr.msra.gmra.mxu2 %vm555_vm1, %v2755_v59  ;;  %v539_v33 = vpack.c.bf16 %v2336_v54, %v2336_v54  ;;  %v538_v34 = vpack.c.bf16 %v2335_v31, %v2335_v31  ;;  %v2898_v31 = vld [vmem:[%s3422_s5 + $0x10] sm:$0xff] }
 0x1a3   : > { %v849_v18 = vunpack.c.l.b16 %v539_v33  ;;  %v848_v35 = vunpack.c.l.b16 %v538_v34 }
 0x1a5   : > { %v2808_v36 = vpack.c.b16 %v849_v18, %v848_v35 }
 0x1a6   : > { %v717_v37 = vpop.permute.xlu0 %716  ;;  %v879_v39 = vpop.permute.xlu1 %878 }
 0x1a7   : > { %v722_v42 = vsel %vm555_vm1, %v717_v37, 0  ;;  %v933_v43 = vpop.permute.xlu2 %932  ;;  %851 = vrot.lane.b32.xlu1 %v2808_v36, %s2600_s29  ;;  %v884_v12 = vsel %vm555_vm1, %v879_v39, 0  ;;  %s2603_s29 = smov 8  }
 0x1a8   : > { %v938_v44 = vsel %vm555_vm1, %v933_v43, 0  ;;  %1701 = vrot.lane.b32.xlu0 %v2755_v59, %s2602_s8  ;;  %731 = vmatpush.bf16.xpose.msrb.mxu1 %v722_v42 }
 0x1a9   : > { %893 = vmatpush.bf16.xpose.msrb.mxu0 %v884_v12  ;;  %947 = vmatpush.bf16.xpose.msrb.mxu2 %v938_v44 }
 0x1aa   : > { %v571_v48 = vpop.f32.mrf.mxu1 }
 0x1ab   : > { %v989_v8 = vadd.f32 %v981_v63, %v571_v48 }
 0x1ad   : > { %v2871_v13 = vadd.f32 %v2866_v10, %v989_v8 }
 0x1ae   : > { %v798_v49 = vpop.permute.xlu0 %797  ;;  %v1452_v50 = vpop.permute.xlu1 %1451 }
 0x1af   : > { %v803_v52 = vsel %vm555_vm1, %v798_v49, 0  ;;  %2188 = vmatmul.msk.bf16.vlgmr.msrb.gmra.mxu3 %vm555_vm1, %v2734_v30  ;;  %1651 = vrot.lane.b32.xlu1 %v2734_v30, %s2602_s8  ;;  %v625_v38 = vpop.f32.mrf.mxu3  ;;  %v1062_v1 = vsel %vm1061_vm2, %v2871_v13, -inf  ;;  %v1577_v34 = vpop.permute.xlu2 %1576 }
 0x1b0   : > { %2186 = vmatmul.msk.bf16.vlgmr.msrb.gmra.mxu1 %vm555_vm1, %v2744_v45  ;;  %2192 = vmatmul.msk.bf16.vlgmr.msrb.gmra.mxu0 %vm555_vm1, %v2746_v51  ;;  %v992_v51 = vadd.f32 %v982_v53, %v600_v57  ;;  %v993_v41 = vadd.f32 %v981_v63, %v625_v38 }
 0x1b1   : > { %2194 = vmatmul.msk.bf16.vlgmr.msrb.gmra.mxu2 %vm555_vm1, %v2771_v4  ;;  %1464 = vmatpush.bf16.msra.mxu0 %v1452_v50 }
 0x1b2   : > { %812 = vmatpush.bf16.xpose.msra.mxu1 %v803_v52  ;;  %v573_v55 = vpop.f32.mrf.mxu1  ;;  %v2843_v27 = vadd.f32 %v2840_v61, %v992_v51 }
 0x1b3   : > { %v990_v30 = vadd.f32 %v982_v53, %v573_v55 }
 0x1b4   : > { %v1071_v62 = vsel %vm1061_vm2, %v2843_v27, -inf }
 0x1b5   : > { %1564 = vmatpush.bf16.msrb.mxu0 %v1552_v32  ;;  %v2834_v45 = vadd.f32 %v2831_v56, %v990_v30  ;;  %v2925_v30 = vld [vmem:[%s3422_s5 + $0x30] sm:$0xff] }
 0x1b6   : > { %v1502_v58 = vpop.permute.xlu1 %1501 }
 0x1b7   : > { %1676 = vrot.lane.b32.xlu1 %v2757_v60, %s2602_s8  ;;  %v1065_v59 = vsel %vm1061_vm2, %v2834_v45, -inf  ;;  %1514 = vmatpush.bf16.msra.mxu2 %v1502_v58  ;;  %v627_v15 = vpop.f32.mrf.mxu3  ;;  %v1527_v12 = vpop.permute.xlu2 %1526 }
 0x1b8   : > { %1066 = vmax.xlane.f32.xlu2 %v1065_v59  ;;  %v994_v17 = vadd.f32 %v982_v53, %v627_v15 }
 0x1ba   : > { %v652_v7 = vpop.f32.mrf.mxu1  ;;  %v2883_v21 = vadd.f32 %v2880_v20, %v994_v17 }
 0x1bb   : > { %v995_v9 = vadd.f32 %v981_v63, %v652_v7 }
 0x1bc   : > { %v1077_v25 = vsel %vm1061_vm2, %v2883_v21, -inf }
 0x1bd   : > { %v2874_v16 = vadd.f32 %v2868_v11, %v995_v9 }
 0x1bf   : > { %v1080_v19 = vsel %vm1061_vm2, %v2874_v16, -inf  ;;  %v2913_v50 = vpop.permute.xlu2 %1751 }
 0x1c0   : > { %2189 = vmatmul.msk.bf16.vlgmr.msra.gmra.mxu1 %vm555_vm1, %v2757_v60  ;;  %1072 = vmax.xlane.f32.xlu2 %v1071_v62  ;;  %v2862_v60 = vadd.f32 %v2859_v6, %v993_v41 }
 0x1c2   : > { %v1074_v46 = vsel %vm1061_vm2, %v2862_v60, -inf  ;;  %v654_v22 = vpop.f32.mrf.mxu1 }
 0x1c3   : > { %v996_v23 = vadd.f32 %v982_v53, %v654_v22 }
 0x1c5   : > { %v2890_v28 = vadd.f32 %v2887_v26, %v996_v23 }
 0x1c7   : > { %v1083_v29 = vsel %vm1061_vm2, %v2890_v28, -inf  ;;  %v1627_v59 = vpop.permute.xlu2 %1626 }
 0x1d2   : > { %1069 = vmax.xlane.f32.xlu0 %v1068_v5  ;;  %v2938_v5 = vld [vmem:[%s3422_s5 + $0x18] sm:$0xff] }
 0x1da   : > { %1075 = vmax.xlane.f32.xlu0 %v1074_v46  ;;  %v2950_v46 = vld [vmem:[%s3422_s5 + $0x38] sm:$0xff] }
 0x1e1   : > { %1063 = vmax.xlane.f32.xlu1 %v1062_v1 }
 0x1e2   : > { %1081 = vmax.xlane.f32.xlu0 %v1080_v19 }
 0x1e9   : > { %1078 = vmax.xlane.f32.xlu1 %v1077_v25 }
 0x1f1   : > { %1084 = vmax.xlane.f32.xlu1 %v1083_v29 }
 0x1f9   : > { %v906_v40 = vpop.permute.xlu0 %905 }
 0x1fa   : > { %v911_v54 = vsel %vm555_vm1, %v906_v40, 0  ;;  %v2964_v40 = vld [vmem:[%s3422_s5 + $0x20] sm:$0xff] }
 0x1fb   : > { %920 = vmatpush.bf16.xpose.msrb.mxu1 %v911_v54 }
 0x201   : > { %v1477_v32 = vpop.permute.xlu0 %1476 }
 0x202   : > { %v679_v33 = vpop.f32.mrf.mxu2  ;;  %2193 = vmatmul.msk.bf16.vlgmr.msrb.gmra.mxu1 %vm555_vm1, %v2787_v14 }
 0x203   : > { %v997_v18 = vadd.f32 %v2898_v31, %v679_v33  ;;  %1489 = vmatpush.bf16.msra.mxu1 %v1477_v32 }
 0x205   : > { %v2904_v35 = vadd.f32 %v2866_v10, %v997_v18 }
 0x207   : > { %1589 = vmatpush.bf16.msrb.mxu1 %v1577_v34  ;;  %v1086_v37 = vsel %vm1061_vm2, %v2904_v35, -inf }
 0x208   : > { %1087 = vmax.xlane.f32.xlu1 %v1086_v37 }
 0x20a   : > { %v960_v39 = vpop.permute.xlu0 %959  ;;  %v2915_v52 = vpop.f32.mrf.mxu2 }
 0x20b   : > { %v965_v47 = vsel %vm555_vm1, %v960_v39, 0 }
 0x212   : > { %v1602_v42 = vpop.permute.xlu0 %1601  ;;  %v760_v62 = vpop.f32.mrf.mxu2 }
 0x213   : > { %1614 = vmatpush.bf16.msrb.mxu2 %v1602_v42 }
 0x219   : > { %v852_v43 = vpop.permute.xlu1 %851 }
 0x21a   : > { %v857_v44 = vsel %vm555_vm1, %v852_v43, 0  ;;  %v2956_v25 = vpop.f32.mrf.mxu2  ;;  %v2973_v37 = vpop.permute.xlu0 %1701 }
 0x21b   : > { %866 = vmatpush.bf16.xpose.msra.mxu3 %v857_v44 }
 0x222   : > { %v706_v48 = vpop.f32.mrf.mxu3  ;;  %2191 = vmatmul.msk.bf16.vlgmr.msra.gmra.mxu3 %vm555_vm1, %v2808_v36 }
 0x223   : > { %974 = vmatpush.bf16.xpose.msrb.mxu3 %v965_v47  ;;  %v999_v49 = vadd.f32 %v2898_v31, %v706_v48 }
 0x224   : > { %v2983_v44 = vpop.f32.mrf.mxu2 }
 0x225   : > { %v2918_v53 = vadd.f32 %v2852_v2, %v999_v49 }
 0x227   : > { %v1092_v55 = vsel %vm1061_vm2, %v2918_v53, -inf }
 0x228   : > { %1093 = vmax.xlane.f32.xlu2 %v1092_v55 }
 0x22a   : > { %v708_v57 = vpop.f32.mrf.mxu3 }
 0x22b   : > { %1539 = vmatpush.bf16.msra.mxu3 %v1527_v12  ;;  %v1000_v7 = vadd.f32 %v2938_v5, %v708_v57  ;;  %v1067_v1 = vpop.xlane.xlu2 %1066  ;;  %v2981_v12 = vpop.permute.xlu1 %1651 }
 0x22c   : > { %v1159_v54 = vsub.f32 %v2834_v45, %v1067_v1 }
 0x22d   : > { %v733_v58 = vpop.f32.mrf.mxu1  ;;  %v895_v51 = vpop.f32.mrf.mxu0  ;;  %v2954_v22 = vadd.f32 %v2840_v61, %v1000_v7 }
 0x22e   : > { %v1001_v63 = vadd.f32 %v2898_v31, %v733_v58  ;;  %v1013_v0 = vadd.f32 %v2925_v30, %v895_v51  ;;  %v1192_v39 = vmul.f32 1.442695, %v1159_v54  ;;  %v1003_v58 = vadd.f32 %v2898_v31, %v760_v62  ;;  %v3009_v31 = vld [vmem:[%s3422_s5 + $0x28] sm:$0xff] }
 0x22f   : > { %v1095_v18 = vsel %vm1061_vm2, %v2954_v22, -inf }
 0x230   : > { %v2930_v38 = vadd.f32 %v2866_v10, %v1013_v0  ;;  %v2933_v41 = vadd.f32 %v2859_v6, %v1001_v63  ;;  %2409 = vpow2.f32 %v1192_v39  ;;  %v843_v0 = vpop.f32.mrf.mxu2 }
 0x231   : > { %v1010_v1 = vadd.f32 %v3009_v31, %v843_v0  ;;  %v998_v0 = vadd.f32 %v2938_v5, %v2915_v52 }
 0x232   : > { %2195 = vmatmul.msk.bf16.vlgmr.msrb.gmra.mxu3 %vm555_vm1, %v2795_v24  ;;  %v1134_v8 = vsel %vm1061_vm2, %v2930_v38, -inf  ;;  %v1098_v9 = vsel %vm1061_vm2, %v2933_v41, -inf  ;;  %v787_v23 = vpop.f32.mrf.mxu3 }
 0x233   : > { %1135 = vmax.xlane.f32.xlu0 %v1134_v8  ;;  %1099 = vmax.xlane.f32.xlu2 %v1098_v9  ;;  %v1005_v32 = vadd.f32 %v2964_v40, %v787_v23  ;;  %v3000_v63 = vpop.permute.xlu1 %1676  ;;  %v1073_v7 = vpop.xlane.xlu2 %1072 }
 0x234   : > { %1639 = vmatpush.bf16.msrb.mxu3 %v1627_v59  ;;  %v1161_v62 = vsub.f32 %v2843_v27, %v1073_v7 }
 0x235   : > { %v735_v15 = vpop.f32.mrf.mxu1  ;;  %v897_v17 = vpop.f32.mrf.mxu0  ;;  %v2976_v42 = vadd.f32 %v2866_v10, %v1005_v32 }
 0x236   : > { %v1014_v19 = vadd.f32 %v2950_v46, %v897_v17  ;;  %v1002_v33 = vadd.f32 %v2938_v5, %v735_v15  ;;  %v2993_v57 = vpop.eup %2409  ;;  %v3004_v15 = vadd.f32 %v2868_v11, %v1003_v58  ;;  %v1196_v23 = vmul.f32 1.442695, %v1161_v62 }
 0x237   : > { %v1110_v48 = vsel %vm1061_vm2, %v2976_v42, -inf  ;;  %v1257_v59 = vsel %vm1061_vm2, %v2993_v57, 0.0 }
 0x238   : > { %v2959_v29 = vadd.f32 %v2831_v56, %v1014_v19  ;;  %v2979_v45 = vadd.f32 %v2880_v20, %v1002_v33  ;;  %v1104_v19 = vsel %vm1061_vm2, %v3004_v15, -inf  ;;  %v3017_v33 = vadd.f32 %v2880_v20, %v1010_v1 }
 0x23a   : > { %v1137_v34 = vsel %vm1061_vm2, %v2959_v29, -inf  ;;  %v1101_v49 = vsel %vm1061_vm2, %v2979_v45, -inf }
 0x23b   : > { %1138 = vmax.xlane.f32.xlu1 %v1137_v34  ;;  %1096 = vmax.xlane.f32.xlu0 %v1095_v18  ;;  %v949_v34 = vpop.f32.mrf.mxu2 }
 0x23d   : > { %v814_v43 = vpop.f32.mrf.mxu1 }
 0x23e   : > { %v1007_v47 = vadd.f32 %v2964_v40, %v814_v43 }
 0x240   : > { %v2991_v55 = vadd.f32 %v2852_v2, %v1007_v47  ;;  %v1017_v47 = vadd.f32 %v2925_v30, %v949_v34 }
 0x242   : > { %v1116_v51 = vsel %vm1061_vm2, %v2991_v55, -inf }
 0x243   : > { %1111 = vmax.xlane.f32.xlu1 %v1110_v48  ;;  %1102 = vmax.xlane.f32.xlu0 %v1101_v49 }
 0x245   : > { %v1070_v10 = vpop.xlane.xlu0 %1069 }
 0x24b   : > { %1117 = vmax.xlane.f32.xlu1 %v1116_v51  ;;  %1258 = vadd.xlane.f32.xlu0 %v1257_v59  ;;  %v3030_v51 = vadd.f32 %v2859_v6, %v1017_v47  ;;  %v816_v47 = vpop.f32.mrf.mxu1 }
 0x24d   : > { %v1076_v8 = vpop.xlane.xlu0 %1075 }
 0x24e   : > { %v1162_v9 = vsub.f32 %v2862_v60, %v1076_v8 }
 0x250   : > { %v1198_v17 = vmul.f32 1.442695, %v1162_v9  ;;  %v1146_v9 = vsel %vm1061_vm2, %v3030_v51, -inf }
 0x252   : > { %2411 = vpow2.f32 %v1198_v17 }
 0x253   : > { %1105 = vmax.xlane.f32.xlu1 %v1104_v19  ;;  %2413 = vpow2.f32 %v1196_v23 }
 0x254   : > { %v1064_v60 = vpop.xlane.xlu1 %1063 }
 0x255   : > { %v1158_v54 = vsub.f32 %v2871_v13, %v1064_v60  ;;  %v1082_v32 = vpop.xlane.xlu0 %1081  ;;  %v1125_v13 = vsel %vm1061_vm2, %v3017_v33, -inf }
 0x256   : > { %v1164_v27 = vsub.f32 %v2874_v16, %v1082_v32  ;;  %v1160_v16 = vsub.f32 %v2855_v3, %v1070_v10  ;;  %v3044_v3 = vadd.f32 %v2831_v56, %v998_v0 }
 0x257   : > { %v1190_v18 = vmul.f32 1.442695, %v1158_v54  ;;  %v789_v54 = vpop.f32.mrf.mxu3 }
 0x258   : > { %v3019_v39 = vpop.eup %2411  ;;  %v1202_v48 = vmul.f32 1.442695, %v1164_v27  ;;  %v1194_v62 = vmul.f32 1.442695, %v1160_v16  ;;  %v1089_v19 = vsel %vm1061_vm2, %v3044_v3, -inf  ;;  %v1009_v27 = vadd.f32 %v2964_v40, %v2983_v44 }
 0x259   : > { %2415 = vpow2.f32 %v1190_v18  ;;  %v1266_v43 = vsel %vm1061_vm2, %v3019_v39, 0.0  ;;  %v3027_v58 = vpop.eup %2413 }
 0x25a   : > { %1267 = vadd.xlane.f32.xlu0 %v1266_v43  ;;  %2417 = vpow2.f32 %v1202_v48  ;;  %v1263_v8 = vsel %vm1061_vm2, %v3027_v58, 0.0  ;;  %v1008_v48 = vadd.f32 %v3009_v31, %v816_v47 }
 0x25b   : > { %1126 = vmax.xlane.f32.xlu1 %v1125_v13  ;;  %2419 = vpow2.f32 %v1194_v62  ;;  %v3068_v13 = vadd.f32 %v2859_v6, %v1009_v27  ;;  %v1004_v6 = vadd.f32 %v2938_v5, %v2956_v25  ;;  %v951_v27 = vpop.f32.mrf.mxu2 }
 0x25c   : > { %v1079_v49 = vpop.xlane.xlu1 %1078  ;;  %v3076_v44 = vadd.f32 %v2840_v61, %v1008_v48 }
 0x25d   : > { %v1122_v0 = vsel %vm1061_vm2, %v3068_v13, -inf  ;;  %v3084_v62 = vadd.f32 %v2887_v26, %v1004_v6 }
 0x25f   : > { %v3032_v59 = vpop.eup %2415 }
 0x260   : > { %v1254_v7 = vsel %vm1061_vm2, %v3032_v59, 0.0  ;;  %v3047_v10 = vpop.eup %2417 }
 0x261   : > { %1255 = vadd.xlane.f32.xlu2 %v1254_v7  ;;  %v1272_v23 = vsel %vm1061_vm2, %v3047_v10, 0.0  ;;  %v3053_v60 = vpop.eup %2419 }
 0x262   : > { %1264 = vadd.xlane.f32.xlu0 %v1263_v8  ;;  %v1260_v34 = vsel %vm1061_vm2, %v3053_v60, 0.0  ;;  %v1119_v8 = vsel %vm1061_vm2, %v3076_v44, -inf }
 0x263   : > { %1147 = vmax.xlane.f32.xlu1 %v1146_v9 }
 0x264   : > { %v1085_v17 = vpop.xlane.xlu1 %1084 }
 0x265   : > { %v1165_v52 = vsub.f32 %v2890_v28, %v1085_v17  ;;  %v1006_v28 = vadd.f32 %v3009_v31, %v789_v54 }
 0x267   : > { %v1204_v1 = vmul.f32 1.442695, %v1165_v52  ;;  %v3065_v43 = vadd.f32 %v2831_v56, %v1006_v28  ;;  %v1163_v56 = vsub.f32 %v2883_v21, %v1079_v49 }
 0x269   : > { %2421 = vpow2.f32 %v1204_v1  ;;  %1090 = vmax.xlane.f32.xlu2 %v1089_v19  ;;  %v1113_v16 = vsel %vm1061_vm2, %v3065_v43, -inf  ;;  %v1200_v9 = vmul.f32 1.442695, %v1163_v56  ;;  %v1107_v1 = vsel %vm1061_vm2, %v3084_v62, -inf }
 0x26a   : > { %1273 = vadd.xlane.f32.xlu0 %v1272_v23 }
 0x26b   : > { %2423 = vpow2.f32 %v1200_v9 }
 0x26f   : > { %v3055_v32 = vpop.eup %2421 }
 0x270   : > { %v1275_v18 = vsel %vm1061_vm2, %v3055_v32, 0.0 }
 0x271   : > { %1261 = vadd.xlane.f32.xlu2 %v1260_v34  ;;  %v3094_v25 = vpop.eup %2423 }
 0x272   : > { %1276 = vadd.xlane.f32.xlu0 %v1275_v18  ;;  %v1269_v19 = vsel %vm1061_vm2, %v3094_v25, 0.0 }
 0x279   : > { %1114 = vmax.xlane.f32.xlu2 %v1113_v16 }
 0x27a   : > { %1123 = vmax.xlane.f32.xlu0 %v1122_v0  ;;  %v1018_v0 = vadd.f32 %v2950_v46, %v951_v27 }
 0x27b   : > { %v1088_v28 = vpop.xlane.xlu1 %1087 }
 0x27c   : > { %v1166_v16 = vsub.f32 %v2904_v35, %v1088_v28 }
 0x27f   : > { %v922_v7 = vpop.f32.mrf.mxu1 }
 0x280   : > { %v1015_v49 = vadd.f32 %v2925_v30, %v922_v7  ;;  %v1206_v7 = vmul.f32 1.442695, %v1166_v16 }
 0x281   : > { %1120 = vmax.xlane.f32.xlu2 %v1119_v8 }
 0x282   : > { %v3100_v23 = vadd.f32 %v2852_v2, %v1015_v49  ;;  %2425 = vpow2.f32 %v1206_v7 }
 0x284   : > { %v1140_v54 = vsel %vm1061_vm2, %v3100_v23, -inf }
 0x287   : > { %v924_v17 = vpop.f32.mrf.mxu1 }
 0x288   : > { %v1016_v52 = vadd.f32 %v2950_v46, %v924_v17 }
 0x289   : > { %1108 = vmax.xlane.f32.xlu2 %v1107_v1 }
 0x28a   : > { %v3090_v21 = vadd.f32 %v2840_v61, %v1016_v52  ;;  %v3115_v52 = vadd.f32 %v2880_v20, %v1018_v0 }
 0x28c   : > { %v1143_v5 = vsel %vm1061_vm2, %v3090_v21, -inf  ;;  %v1149_v49 = vsel %vm1061_vm2, %v3115_v52, -inf }
 0x28d   : > { %1144 = vmax.xlane.f32.xlu0 %v1143_v5 }
 0x291   : > { %1270 = vadd.xlane.f32.xlu2 %v1269_v19 }
 0x299   : > { %1141 = vmax.xlane.f32.xlu2 %v1140_v54 }
 0x29b   : > { %v1094_v34 = vpop.xlane.xlu2 %1093 }
 0x29c   : > { %v1168_v5 = vsub.f32 %v2918_v53, %v1094_v34 }
 0x29e   : > { %v1210_v54 = vmul.f32 1.442695, %v1168_v5 }
 0x2a5   : > { %v868_v61 = vpop.f32.mrf.mxu3 }
 0x2a6   : > { %v1011_v18 = vadd.f32 %v2964_v40, %v868_v61  ;;  %v1136_v47 = vpop.xlane.xlu0 %1135  ;;  %v1100_v9 = vpop.xlane.xlu2 %1099 }
 0x2a7   : > { %v1182_v2 = vsub.f32 %v2930_v38, %v1136_v47  ;;  %v1170_v38 = vsub.f32 %v2933_v41, %v1100_v9 }
 0x2a8   : > { %v3106_v48 = vadd.f32 %v2868_v11, %v1011_v18  ;;  %v3127_v18 = vpop.eup %2425 }
 0x2a9   : > { %v1238_v8 = vmul.f32 1.442695, %v1182_v2  ;;  %v1214_v20 = vmul.f32 1.442695, %v1170_v38 }
 0x2aa   : > { %v1128_v56 = vsel %vm1061_vm2, %v3106_v48, -inf }
 0x2ab   : > { %1129 = vmax.xlane.f32.xlu2 %v1128_v56  ;;  %2427 = vpow2.f32 %v1238_v8 }
 0x2ac   : > { %2429 = vpow2.f32 %v1214_v20 }
 0x2ad   : > { %v870_v6 = vpop.f32.mrf.mxu3  ;;  %2431 = vpow2.f32 %v1210_v54 }
 0x2ae   : > { %v1012_v40 = vadd.f32 %v3009_v31, %v870_v6  ;;  %v1139_v17 = vpop.xlane.xlu1 %1138  ;;  %v1097_v1 = vpop.xlane.xlu0 %1096 }
 0x2af   : > { %v1169_v53 = vsub.f32 %v2954_v22, %v1097_v1  ;;  %v1183_v47 = vsub.f32 %v2959_v29, %v1139_v17 }
 0x2b0   : > { %v3118_v35 = vadd.f32 %v2887_v26, %v1012_v40 }
 0x2b1   : > { %v3129_v41 = vpop.eup %2427 }
 0x2b2   : > { %v1131_v31 = vsel %vm1061_vm2, %v3118_v35, -inf  ;;  %v1326_v22 = vsel %vm1061_vm2, %v3129_v41, 0.0  ;;  %v3146_v6 = vpop.eup %2429 }
 0x2b3   : > { %1150 = vmax.xlane.f32.xlu2 %v1149_v49  ;;  %1132 = vmax.xlane.f32.xlu0 %v1131_v31  ;;  %v3148_v8 = vpop.eup %2431  ;;  %v1290_v17 = vsel %vm1061_vm2, %v3146_v6, 0.0 }
 0x2b5   : > { %v976_v19 = vpop.f32.mrf.mxu3 }
 0x2b6   : > { %v1019_v61 = vadd.f32 %v2925_v30, %v976_v19  ;;  %v1112_v28 = vpop.xlane.xlu1 %1111  ;;  %v1278_v30 = vsel %vm1061_vm2, %v3127_v18, 0.0  ;;  %v1103_v0 = vpop.xlane.xlu0 %1102 }
 0x2b7   : > { %v1174_v27 = vsub.f32 %v2976_v42, %v1112_v28  ;;  %v1240_v42 = vmul.f32 1.442695, %v1183_v47 }
 0x2b8   : > { %v3133_v34 = vadd.f32 %v2868_v11, %v1019_v61  ;;  %v1212_v11 = vmul.f32 1.442695, %v1169_v53 }
 0x2b9   : > { %v1222_v2 = vmul.f32 1.442695, %v1174_v27 }
 0x2ba   : > { %v1152_v16 = vsel %vm1061_vm2, %v3133_v34, -inf  ;;  %2433 = vpow2.f32 %v1212_v11 }
 0x2bb   : > { %1153 = vmax.xlane.f32.xlu1 %v1152_v16  ;;  %1279 = vadd.xlane.f32.xlu2 %v1278_v30  ;;  %2435 = vpow2.f32 %v1222_v2 }
 0x2bc   : > { %1327 = vadd.xlane.f32.xlu0 %v1326_v22  ;;  %2437 = vpow2.f32 %v1240_v42 }
 0x2bd   : > { %v978_v56 = vpop.f32.mrf.mxu3 }
 0x2be   : > { %v1020_v7 = vadd.f32 %v2950_v46, %v978_v56  ;;  %v3144_v29 = vpop.xlane.xlu1 %1117  ;;  %v1284_v46 = vsel %vm1061_vm2, %v3148_v8, 0.0  ;;  %v1259_v38 = vpop.xlane.xlu0 %1258 }
 0x2c0   : > { %v3151_v9 = vadd.f32 %v2887_v26, %v1020_v7  ;;  %v3159_v1 = vpop.eup %2433 }
 0x2c1   : > { %v3161_v26 = vpop.eup %2435  ;;  %v1287_v19 = vsel %vm1061_vm2, %v3159_v1, 0.0 }
 0x2c2   : > { %v1155_v40 = vsel %vm1061_vm2, %v3151_v9, -inf  ;;  %v3164_v31 = vpop.eup %2437  ;;  %v1302_v54 = vsel %vm1061_vm2, %v3161_v26, 0.0 }
 0x2c3   : > { %1156 = vmax.xlane.f32.xlu1 %v1155_v40  ;;  %1291 = vadd.xlane.f32.xlu2 %v1290_v17  ;;  %v1329_v61 = vsel %vm1061_vm2, %v3164_v31, 0.0  ;;  %v1171_v17 = vsub.f32 %v2979_v45, %v1103_v0  ;;  %v1176_v45 = vsub.f32 %v2991_v55, %v3144_v29 }
 0x2c4   : > { %1285 = vadd.xlane.f32.xlu0 %v1284_v46 }
 0x2c6   : > { %v1106_v5 = vpop.xlane.xlu1 %1105 }
 0x2c7   : > { %v1172_v49 = vsub.f32 %v3004_v15, %v1106_v5 }
 0x2c9   : > { %v1218_v20 = vmul.f32 1.442695, %v1172_v49 }
 0x2cb   : > { %2439 = vpow2.f32 %v1218_v20  ;;  %1288 = vadd.xlane.f32.xlu1 %v1287_v19  ;;  %1303 = vadd.xlane.f32.xlu2 %v1302_v54  ;;  %v1216_v20 = vmul.f32 1.442695, %v1171_v17 }
 0x2cc   : > { %1330 = vadd.xlane.f32.xlu0 %v1329_v61  ;;  %2441 = vrcp.f32 %v1259_v38 }
 0x2cd   : > { %v3172_v28 = vpop.xlane.xlu0 %1267 }
 0x2d1   : > { %v3174_v15 = vpop.eup %2439 }
 0x2d2   : > { %v1296_v53 = vsel %vm1061_vm2, %v3174_v15, 0.0  ;;  %v2442_v47 = vpop.eup %2441 }
 0x2d3   : > { %1297 = vadd.xlane.f32.xlu2 %v1296_v53  ;;  %v1383_v30 = vmul.f32 %v2442_v47, %v2993_v57  ;;  %v1226_v47 = vmul.f32 1.442695, %v1176_v45 }
 0x2d4   : > { %v1256_v27 = vpop.xlane.xlu2 %1255 }
 0x2d5   : > { %v1265_v16 = vpop.xlane.xlu0 %1264  ;;  %2443 = vrcp.f32 %v1256_v27  ;;  %v1415_v11 = vpack.c.bf16 %v1383_v30, %v1383_v30 }
 0x2d6   : > { %2445 = vrcp.f32 %v1265_v16 }
 0x2d7   : > { %v1449_v38 = vunpack.c.l.b16 %v1415_v11 }
 0x2db   : > { %v2444_v22 = vpop.eup %2443 }
 0x2dc   : > { %v1382_v2 = vmul.f32 %v2444_v22, %v3032_v59  ;;  %v1091_v56 = vpop.xlane.xlu2 %1090  ;;  %v2446_v19 = vpop.eup %2445 }
 0x2dd   : > { %v1274_v42 = vpop.xlane.xlu0 %1273  ;;  %v1167_v7 = vsub.f32 %v3044_v3, %v1091_v56  ;;  %v1385_v0 = vmul.f32 %v2446_v19, %v3027_v58 }
 0x2de   : > { %v1414_v40 = vpack.c.bf16 %v1382_v2, %v1382_v2  ;;  %2447 = vrcp.f32 %v1274_v42 }
 0x2df   : > { %v1208_v46 = vmul.f32 1.442695, %v1167_v7  ;;  %v1417_v16 = vpack.c.bf16 %v1385_v0, %v1385_v0  ;;  %v1127_v0 = vpop.xlane.xlu1 %1126 }
 0x2e0   : > { %v1448_v5 = vunpack.c.l.b16 %v1414_v40 }
 0x2e1   : > { %2449 = vpow2.f32 %v1208_v46 }
 0x2e2   : > { %v1450_v49 = vpack.c.b16 %v1449_v38, %v1448_v5 }
 0x2e4   : > { %2196 = vmatmul.msk.bf16.vlgmr.msra.gmra.mxu0 %vm1061_vm2, %v1450_v49  ;;  %v1262_v57 = vpop.xlane.xlu2 %1261  ;;  %v2448_v3 = vpop.eup %2447 }
 0x2e5   : > { %v1277_v59 = vpop.xlane.xlu0 %1276  ;;  %1664 = vmatpush.bf16.msra.mxu0 %v2981_v12  ;;  %2451 = vrcp.f32 %v1262_v57  ;;  %v1388_v53 = vmul.f32 %v2448_v3, %v3047_v10  ;;  %v1474_v10 = vunpack.c.l.b16 %v1417_v16 }
 0x2e6   : > { %2453 = vrcp.f32 %v1277_v59 }
 0x2e7   : > { %v3184_v54 = vpop.eup %2449  ;;  %2455 = vpow2.f32 %v1216_v20  ;;  %v1420_v2 = vpack.c.bf16 %v1388_v53, %v1388_v53  ;;  %v1179_v53 = vsub.f32 %v3017_v33, %v1127_v0 }
 0x2e8   : > { %v1281_v61 = vsel %vm1061_vm2, %v3184_v54, 0.0  ;;  %2457 = vpow2.f32 %v1226_v47 }
 0x2e9   : > { %1282 = vadd.xlane.f32.xlu0 %v1281_v61  ;;  %v1523_v17 = vunpack.c.l.b16 %v1420_v2  ;;  %v1232_v47 = vmul.f32 1.442695, %v1179_v53 }
 0x2eb   : > { %v2452_v27 = vpop.eup %2451 }
 0x2ec   : > { %v2454_v12 = vpop.eup %2453  ;;  %v1384_v30 = vmul.f32 %v2452_v27, %v3053_v60  ;;  %v1115_v22 = vpop.xlane.xlu2 %1114 }
 0x2ed   : > { %v3193_v11 = vpop.eup %2455  ;;  %v1389_v55 = vmul.f32 %v2454_v12, %v3055_v32  ;;  %v1175_v58 = vsub.f32 %v3065_v43, %v1115_v22  ;;  %v1124_v5 = vpop.xlane.xlu0 %1123 }
 0x2ee   : > { %v1416_v29 = vpack.c.bf16 %v1384_v30, %v1384_v30  ;;  %v1293_v40 = vsel %vm1061_vm2, %v3193_v11, 0.0  ;;  %v3200_v43 = vpop.eup %2457  ;;  %v1178_v57 = vsub.f32 %v3068_v13, %v1124_v5 }
 0x2ef   : > { %v1421_v56 = vpack.c.bf16 %v1389_v55, %v1389_v55  ;;  %v1224_v42 = vmul.f32 1.442695, %v1175_v58  ;;  %v1308_v59 = vsel %vm1061_vm2, %v3200_v43, 0.0 }
 0x2f0   : > { %v1473_v7 = vunpack.c.l.b16 %v1416_v29  ;;  %v1230_v45 = vmul.f32 1.442695, %v1178_v57 }
 0x2f1   : > { %v1524_v46 = vunpack.c.l.b16 %v1421_v56  ;;  %2459 = vpow2.f32 %v1224_v42  ;;  %1294 = vadd.xlane.f32.xlu0 %v1293_v40  ;;  %v1148_v56 = vpop.xlane.xlu1 %1147 }
 0x2f2   : > { %v1475_v60 = vpack.c.b16 %v1474_v10, %v1473_v7 }
 0x2f3   : > { %v1525_v38 = vpack.c.b16 %v1524_v46, %v1523_v17  ;;  %v1186_v17 = vsub.f32 %v3030_v51, %v1148_v56 }
 0x2f4   : > { %2197 = vmatmul.msk.bf16.vlgmr.msra.gmra.mxu1 %vm1061_vm2, %v1475_v60  ;;  %v1121_v32 = vpop.xlane.xlu2 %1120 }
 0x2f5   : > { %2199 = vmatmul.msk.bf16.vlgmr.msra.gmra.mxu3 %vm1061_vm2, %v1525_v38  ;;  %1689 = vmatpush.bf16.msra.mxu1 %v3000_v63  ;;  %v1177_v49 = vsub.f32 %v3076_v44, %v1121_v32  ;;  %v1246_v32 = vmul.f32 1.442695, %v1186_v17 }
 0x2f7   : > { %v3205_v20 = vpop.eup %2459  ;;  %v1228_v19 = vmul.f32 1.442695, %v1177_v49 }
 0x2f8   : > { %v1305_v3 = vsel %vm1061_vm2, %v3205_v20, 0.0 }
 0x2f9   : > { %2461 = vpow2.f32 %v1228_v19  ;;  %1309 = vadd.xlane.f32.xlu0 %v1308_v59  ;;  %1306 = vadd.xlane.f32.xlu1 %v1305_v3 }
 0x2fa   : > { %2463 = vpow2.f32 %v1230_v45 }
 0x2fb   : > { %2465 = vrcp.f32 %v3172_v28 }
 0x2fc   : > { %v1109_v61 = vpop.xlane.xlu2 %1108 }
 0x2fd   : > { %v1173_v63 = vsub.f32 %v3084_v62, %v1109_v61 }
 0x2ff   : > { %v3213_v44 = vpop.eup %2461  ;;  %v1220_v13 = vmul.f32 1.442695, %v1173_v63 }
 0x300   : > { %v1311_v27 = vsel %vm1061_vm2, %v3213_v44, 0.0  ;;  %v1145_v12 = vpop.xlane.xlu0 %1144  ;;  %v3219_v30 = vpop.eup %2463 }
 0x301   : > { %2467 = vpow2.f32 %v1220_v13  ;;  %1312 = vadd.xlane.f32.xlu1 %v1311_v27  ;;  %v2466_v22 = vpop.eup %2465  ;;  %v1185_v33 = vsub.f32 %v3090_v21, %v1145_v12  ;;  %v1314_v28 = vsel %vm1061_vm2, %v3219_v30, 0.0 }
 0x302   : > { %v1386_v55 = vmul.f32 %v2466_v22, %v3019_v39 }
 0x303   : > { %v1244_v58 = vmul.f32 1.442695, %v1185_v33 }
 0x304   : > { %v1271_v16 = vpop.xlane.xlu2 %1270  ;;  %v1418_v7 = vpack.c.bf16 %v1386_v55, %v1386_v55 }
 0x305   : > { %2469 = vrcp.f32 %v1271_v16 }
 0x306   : > { %2471 = vpow2.f32 %v1232_v47  ;;  %v1498_v38 = vunpack.c.l.b16 %v1418_v7 }
 0x307   : > { %v3221_v62 = vpop.eup %2467  ;;  %2473 = vpow2.f32 %v1244_v58 }
 0x308   : > { %v1299_v2 = vsel %vm1061_vm2, %v3221_v62, 0.0 }
 0x309   : > { %1315 = vadd.xlane.f32.xlu1 %v1314_v28  ;;  %1300 = vadd.xlane.f32.xlu0 %v1299_v2 }
 0x30b   : > { %v2470_v29 = vpop.eup %2469 }
 0x30c   : > { %v1142_v42 = vpop.xlane.xlu2 %1141  ;;  %v3229_v10 = vpop.eup %2471  ;;  %v1387_v40 = vmul.f32 %v2470_v29, %v3094_v25 }
 0x30d   : > { %v1184_v21 = vsub.f32 %v3100_v23, %v1142_v42  ;;  %v1317_v39 = vsel %vm1061_vm2, %v3229_v10, 0.0  ;;  %v3236_v57 = vpop.eup %2473 }
 0x30e   : > { %v1419_v46 = vpack.c.bf16 %v1387_v40, %v1387_v40  ;;  %v1335_v51 = vsel %vm1061_vm2, %v3236_v57, 0.0 }
 0x30f   : > { %v1242_v60 = vmul.f32 1.442695, %v1184_v21 }
 0x310   : > { %v1499_v5 = vunpack.c.l.b16 %v1419_v46 }
 0x311   : > { %2475 = vpow2.f32 %v1242_v60  ;;  %1318 = vadd.xlane.f32.xlu1 %v1317_v39 }
 0x312   : > { %v1500_v49 = vpack.c.b16 %v1499_v5, %v1498_v38  ;;  %2477 = vpow2.f32 %v1246_v32 }
 0x314   : > { %2198 = vmatmul.msk.bf16.vlgmr.msra.gmra.mxu2 %vm1061_vm2, %v1500_v49 }
 0x315   : > { %1714 = vmatpush.bf16.msra.mxu2 %v2973_v37 }
 0x317   : > { %v3240_v25 = vpop.eup %2475 }
 0x318   : > { %v1332_v23 = vsel %vm1061_vm2, %v3240_v25, 0.0  ;;  %v3246_v19 = vpop.eup %2477 }
 0x319   : > { %1336 = vadd.xlane.f32.xlu1 %v1335_v51  ;;  %1333 = vadd.xlane.f32.xlu0 %v1332_v23  ;;  %v1338_v45 = vsel %vm1061_vm2, %v3246_v19, 0.0 }
 0x31e   : > { %v1130_v59 = vpop.xlane.xlu2 %1129 }
 0x31f   : > { %v1180_v3 = vsub.f32 %v3106_v48, %v1130_v59 }
 0x321   : > { %v1234_v37 = vmul.f32 1.442695, %v1180_v3  ;;  %1339 = vadd.xlane.f32.xlu1 %v1338_v45 }
 0x323   : > { %2479 = vpow2.f32 %v1234_v37 }
 0x326   : > { %v1133_v0 = vpop.xlane.xlu0 %1132  ;;  %v1151_v61 = vpop.xlane.xlu2 %1150 }
 0x327   : > { %v1181_v63 = vsub.f32 %v3118_v35, %v1133_v0  ;;  %v1187_v53 = vsub.f32 %v3115_v52, %v1151_v61 }
 0x329   : > { %v3253_v13 = vpop.eup %2479  ;;  %v1236_v27 = vmul.f32 1.442695, %v1181_v63  ;;  %v1248_v47 = vmul.f32 1.442695, %v1187_v53 }
 0x32a   : > { %v1320_v12 = vsel %vm1061_vm2, %v3253_v13, 0.0 }
 0x32b   : > { %2481 = vpow2.f32 %v1236_v27  ;;  %1321 = vadd.xlane.f32.xlu2 %v1320_v12 }
 0x32c   : > { %2483 = vpow2.f32 %v1248_v47 }
 0x32e   : > { %v1154_v48 = vpop.xlane.xlu1 %1153 }
 0x32f   : > { %v3257_v16 = vpop.xlane.xlu0 %1327 }
 0x331   : > { %v3259_v22 = vpop.eup %2481 }
 0x332   : > { %v3261_v33 = vpop.eup %2483  ;;  %v1323_v52 = vsel %vm1061_vm2, %v3259_v22, 0.0 }
 0x333   : > { %1324 = vadd.xlane.f32.xlu0 %v1323_v52  ;;  %v1341_v35 = vsel %vm1061_vm2, %v3261_v33, 0.0 }
 0x334   : > { %1342 = vadd.xlane.f32.xlu1 %v1341_v35 }
 0x336   : > { %v1157_v28 = vpop.xlane.xlu1 %1156 }
 0x337   : > { %v1286_v2 = vpop.xlane.xlu0 %1285  ;;  %v1189_v23 = vsub.f32 %v3151_v9, %v1157_v28 }
 0x338   : > { %2485 = vrcp.f32 %v1286_v2 }
 0x33e   : > { %v1289_v55 = vpop.xlane.xlu1 %1288  ;;  %v2486_v58 = vpop.eup %2485 }
 0x33f   : > { %2487 = vrcp.f32 %v1289_v55  ;;  %v1392_v29 = vmul.f32 %v2486_v58, %v3148_v8  ;;  %v1331_v8 = vpop.xlane.xlu0 %1330 }
 0x341   : > { %v1424_v42 = vpack.c.bf16 %v1392_v29, %v1392_v29 }
 0x343   : > { %1776 = vrot.lane.b32.xlu2 %v2787_v14, %s2602_s8  ;;  %v1573_v21 = vunpack.c.l.b16 %v1424_v42  ;;  %v1280_v14 = vpop.xlane.xlu2 %1279 }
 0x344   : > { %2489 = vrcp.f32 %v1280_v14 }
 0x345   : > { %v2488_v56 = vpop.eup %2487 }
 0x346   : > { %v1393_v7 = vmul.f32 %v2488_v56, %v3159_v1  ;;  %v1188_v1 = vsub.f32 %v3133_v34, %v1154_v48 }
 0x347   : > { %1801 = vrot.lane.b32.xlu0 %v2771_v4, %s2602_s8 }
 0x348   : > { %v1425_v40 = vpack.c.bf16 %v1393_v7, %v1393_v7  ;;  %v1250_v38 = vmul.f32 1.442695, %v1188_v1 }
 0x34a   : > { %v1574_v17 = vunpack.c.l.b16 %v1425_v40  ;;  %v2490_v4 = vpop.eup %2489 }
 0x34b   : > { %v1292_v60 = vpop.xlane.xlu2 %1291  ;;  %v1390_v5 = vmul.f32 %v2490_v4, %v3127_v18  ;;  %v1252_v18 = vmul.f32 1.442695, %v1189_v23 }
 0x34c   : > { %v1575_v46 = vpack.c.b16 %v1574_v17, %v1573_v21 }
 0x34d   : > { %1726 = vrot.lane.b32.xlu1 %v2808_v36, %s2602_s8  ;;  %v1422_v32 = vpack.c.bf16 %v1390_v5, %v1390_v5 }
 0x34e   : > { %2201 = vmatmul.msk.bf16.vlgmr.msrb.gmra.mxu1 %vm1061_vm2, %v1575_v46 }
 0x34f   : > { %1826 = vrot.lane.b32.xlu0 %v2795_v24, %s2602_s8  ;;  %v1548_v45 = vunpack.c.l.b16 %v1422_v32  ;;  %s2605_s8 = smov 24  }
 0x353   : > { %v1304_v59 = vpop.xlane.xlu2 %1303 }
 0x35b   : > { %v1298_v56 = vpop.xlane.xlu2 %1297 }
 0x35c   : > { %v1283_v39 = vpop.xlane.xlu0 %1282 }
 0x35d   : > { %2491 = vrcp.f32 %v1283_v39 }
 0x35e   : > { %2493 = vrcp.f32 %v1292_v60 }
 0x35f   : > { %2495 = vpow2.f32 %v1250_v38 }
 0x363   : > { %v2492_v36 = vpop.eup %2491 }
 0x364   : > { %v1391_v49 = vmul.f32 %v2492_v36, %v3184_v54  ;;  %v1295_v51 = vpop.xlane.xlu0 %1294  ;;  %v2494_v24 = vpop.eup %2493 }
 0x365   : > { %2497 = vrcp.f32 %v1295_v51  ;;  %v3282_v3 = vpop.eup %2495  ;;  %v1394_v37 = vmul.f32 %v2494_v24, %v3146_v6 }
 0x366   : > { %v1423_v34 = vpack.c.bf16 %v1391_v49, %v1391_v49  ;;  %2499 = vrcp.f32 %v1304_v59  ;;  %v1344_v54 = vsel %vm1061_vm2, %v3282_v3, 0.0 }
 0x367   : > { %v1426_v53 = vpack.c.bf16 %v1394_v37, %v1394_v37  ;;  %2501 = vpow2.f32 %v1252_v18 }
 0x368   : > { %v1549_v0 = vunpack.c.l.b16 %v1423_v34 }
 0x369   : > { %v1598_v48 = vunpack.c.l.b16 %v1426_v53 }
 0x36a   : > { %v1550_v61 = vpack.c.b16 %v1549_v0, %v1548_v45 }
 0x36b   : > { %v2498_v63 = vpop.eup %2497 }
 0x36c   : > { %v1395_v27 = vmul.f32 %v2498_v63, %v3193_v11  ;;  %v1310_v9 = vpop.xlane.xlu0 %1309  ;;  %v1307_v47 = vpop.xlane.xlu1 %1306  ;;  %1345 = vadd.xlane.f32.xlu2 %v1344_v54  ;;  %2200 = vmatmul.msk.bf16.vlgmr.msrb.gmra.mxu0 %vm1061_vm2, %v1550_v61 }
 0x36d   : > { %1764 = vmatpush.bf16.msrb.mxu0 %v2913_v50  ;;  %v2500_v6 = vpop.eup %2499  ;;  %2503 = vrcp.f32 %v1307_v47 }
 0x36e   : > { %v1427_v12 = vpack.c.bf16 %v1395_v27, %v1395_v27  ;;  %2505 = vrcp.f32 %v1310_v9  ;;  %v1398_v35 = vmul.f32 %v2500_v6, %v3161_v26  ;;  %v3291_v2 = vpop.eup %2501 }
 0x36f   : > { %v1347_v42 = vsel %vm1061_vm2, %v3291_v2, 0.0 }
 0x370   : > { %v1599_v52 = vunpack.c.l.b16 %v1427_v12  ;;  %v1430_v29 = vpack.c.bf16 %v1398_v35, %v1398_v35 }
 0x372   : > { %v1600_v28 = vpack.c.b16 %v1599_v52, %v1598_v48  ;;  %v1648_v40 = vunpack.c.l.b16 %v1430_v29 }
 0x373   : > { %v2504_v11 = vpop.eup %2503 }
 0x374   : > { %v1313_v55 = vpop.xlane.xlu1 %1312  ;;  %2202 = vmatmul.msk.bf16.vlgmr.msrb.gmra.mxu2 %vm1061_vm2, %v1600_v28  ;;  %v2506_v58 = vpop.eup %2505  ;;  %v1399_v50 = vmul.f32 %v2504_v11, %v3205_v20 }
 0x375   : > { %2507 = vrcp.f32 %v1313_v55  ;;  %v1400_v7 = vmul.f32 %v2506_v58, %v3200_v43 }
 0x376   : > { %2509 = vrcp.f32 %v1331_v8  ;;  %v1431_v26 = vpack.c.bf16 %v1399_v50, %v1399_v50 }
 0x377   : > { %2511 = vrcp.f32 %v3257_v16  ;;  %1348 = vadd.xlane.f32.xlu1 %v1347_v42  ;;  %v1432_v1 = vpack.c.bf16 %v1400_v7, %v1400_v7 }
 0x378   : > { %2513 = vrcp.f32 %v1298_v56  ;;  %v1649_v21 = vunpack.c.l.b16 %v1431_v26 }
 0x379   : > { %v1673_v43 = vunpack.c.l.b16 %v1432_v1 }
 0x37a   : > { %v1650_v46 = vpack.c.b16 %v1649_v21, %v1648_v40 }
 0x37b   : > { %v2508_v17 = vpop.eup %2507 }
 0x37c   : > { %v2510_v14 = vpop.eup %2509  ;;  %v1401_v20 = vmul.f32 %v2508_v17, %v3213_v44  ;;  %v1316_v60 = vpop.xlane.xlu1 %1315  ;;  %2204 = vmatmul.msk.bf16.vlgmr.msra.gmra.mxu0 %vm1061_vm2, %v1650_v46 }
 0x37d   : > { %v1301_v8 = vpop.xlane.xlu0 %1300  ;;  %v2512_v39 = vpop.eup %2511  ;;  %v1407_v38 = vmul.f32 %v2510_v14, %v3164_v31 }
 0x37e   : > { %v2514_v4 = vpop.eup %2513  ;;  %v1433_v16 = vpack.c.bf16 %v1401_v20, %v1401_v20  ;;  %2515 = vrcp.f32 %v1301_v8  ;;  %v1406_v36 = vmul.f32 %v2512_v39, %v3129_v41  ;;  %v3318_v39 = vpop.f32.mrf.mxu1 }
 0x37f   : > { %2517 = vrcp.f32 %v1316_v60  ;;  %v1396_v32 = vmul.f32 %v2514_v4, %v3174_v15  ;;  %v1439_v51 = vpack.c.bf16 %v1407_v38, %v1407_v38 }
 0x380   : > { %v1674_v5 = vunpack.c.l.b16 %v1433_v16  ;;  %v1438_v59 = vpack.c.bf16 %v1406_v36, %v1406_v36 }
 0x381   : > { %v1428_v34 = vpack.c.bf16 %v1396_v32, %v1396_v32  ;;  %v1749_v31 = vunpack.c.l.b16 %v1439_v51 }
 0x382   : > { %v1675_v49 = vpack.c.b16 %v1674_v5, %v1673_v43  ;;  %v1748_v18 = vunpack.c.l.b16 %v1438_v59 }
 0x383   : > { %v1623_v41 = vunpack.c.l.b16 %v1428_v34 }
 0x384   : > { %v2516_v44 = vpop.eup %2515  ;;  %2205 = vmatmul.msk.bf16.vlgmr.msra.gmra.mxu1 %vm1061_vm2, %v1675_v49  ;;  %v1319_v24 = vpop.xlane.xlu1 %1318  ;;  %v1750_v63 = vpack.c.b16 %v1749_v31, %v1748_v18 }
 0x385   : > { %v2518_v23 = vpop.eup %2517  ;;  %v1397_v45 = vmul.f32 %v2516_v44, %v3221_v62  ;;  %2519 = vrcp.f32 %v1319_v24  ;;  %v3325_v24 = vpop.f32.mrf.mxu0 }
 0x386   : > { %v1402_v0 = vmul.f32 %v2518_v23, %v3219_v30 }
 0x387   : > { %v1429_v37 = vpack.c.bf16 %v1397_v45, %v1397_v45 }
 0x388   : > { %v1434_v53 = vpack.c.bf16 %v1402_v0, %v1402_v0 }
 0x389   : > { %v1624_v61 = vunpack.c.l.b16 %v1429_v37 }
 0x38a   : > { %v1698_v47 = vunpack.c.l.b16 %v1434_v53 }
 0x38b   : > { %v2520_v15 = vpop.eup %2519  ;;  %v1625_v54 = vpack.c.b16 %v1624_v61, %v1623_v41 }
 0x38c   : > { %v1403_v27 = vmul.f32 %v2520_v15, %v3229_v10  ;;  %2208 = vmatmul.msk.bf16.vlgmr.msrb.gmra.mxu0 %vm1061_vm2, %v1750_v63  ;;  %v1337_v62 = vpop.xlane.xlu1 %1336  ;;  %v1334_v12 = vpop.xlane.xlu0 %1333 }
 0x38d   : > { %2203 = vmatmul.msk.bf16.vlgmr.msrb.gmra.mxu3 %vm1061_vm2, %v1625_v54  ;;  %2521 = vrcp.f32 %v1337_v62  ;;  %v3327_v23 = vpop.f32.mrf.mxu0 }
 0x38e   : > { %v1435_v9 = vpack.c.bf16 %v1403_v27, %v1403_v27  ;;  %2523 = vrcp.f32 %v1334_v12 }
 0x390   : > { %v1699_v6 = vunpack.c.l.b16 %v1435_v9 }
 0x392   : > { %v1700_v48 = vpack.c.b16 %v1699_v6, %v1698_v47 }
 0x393   : > { %v2522_v30 = vpop.eup %2521 }
 0x394   : > { %2206 = vmatmul.msk.bf16.vlgmr.msra.gmra.mxu2 %vm1061_vm2, %v1700_v48  ;;  %v2524_v52 = vpop.eup %2523  ;;  %v1409_v35 = vmul.f32 %v2522_v30, %v3236_v57  ;;  %v1340_v11 = vpop.xlane.xlu1 %1339 }
 0x395   : > { %v1408_v10 = vmul.f32 %v2524_v52, %v3240_v25  ;;  %2525 = vrcp.f32 %v1340_v11 }
 0x396   : > { %v1441_v55 = vpack.c.bf16 %v1409_v35, %v1409_v35  ;;  %v3338_v35 = vpop.f32.mrf.mxu3 }
 0x397   : > { %v1440_v58 = vpack.c.bf16 %v1408_v10, %v1408_v10  ;;  %v3332_v9 = vpop.f32.mrf.mxu2 }
 0x398   : > { %v1774_v29 = vunpack.c.l.b16 %v1441_v55 }
 0x399   : > { %v1773_v56 = vunpack.c.l.b16 %v1440_v58 }
 0x39b   : > { %v1775_v26 = vpack.c.b16 %v1774_v29, %v1773_v56  ;;  %v2526_v40 = vpop.eup %2525 }
 0x39c   : > { %v1410_v21 = vmul.f32 %v2526_v40, %v3246_v19 }
 0x39e   : > { %v1322_v28 = vpop.xlane.xlu2 %1321  ;;  %v1442_v1 = vpack.c.bf16 %v1410_v21, %v1410_v21  ;;  %v3342_v55 = vpop.f32.mrf.mxu3 }
 0x3a0   : > { %v1798_v4 = vunpack.c.l.b16 %v1442_v1 }
 0x3a6   : > { %v1777_v50 = vpop.permute.xlu2 %1776  ;;  %v1325_v7 = vpop.xlane.xlu0 %1324 }
 0x3a7   : > { %v1343_v42 = vpop.xlane.xlu1 %1342  ;;  %1789 = vmatpush.bf16.msrb.mxu1 %v1777_v50 }
 0x3a8   : > { %2527 = vrcp.f32 %v1343_v42 }
 0x3a9   : > { %2529 = vrcp.f32 %v1325_v7 }
 0x3aa   : > { %2209 = vmatmul.msk.bf16.vlgmr.msrb.gmra.mxu1 %vm1061_vm2, %v1775_v26  ;;  %2531 = vrcp.f32 %v1322_v28 }
 0x3ae   : > { %v2528_v57 = vpop.eup %2527 }
 0x3af   : > { %v1411_v25 = vmul.f32 %v2528_v57, %v3261_v33  ;;  %v2530_v17 = vpop.eup %2529 }
 0x3b0   : > { %v2532_v14 = vpop.eup %2531  ;;  %v1405_v20 = vmul.f32 %v2530_v17, %v3259_v22  ;;  %v3321_v22 = vpop.f32.mrf.mxu1 }
 0x3b1   : > { %v1443_v46 = vpack.c.bf16 %v1411_v25, %v1411_v25  ;;  %v1404_v60 = vmul.f32 %v2532_v14, %v3253_v13 }
 0x3b2   : > { %v1437_v16 = vpack.c.bf16 %v1405_v20, %v1405_v20 }
 0x3b3   : > { %v1799_v8 = vunpack.c.l.b16 %v1443_v46  ;;  %v1436_v43 = vpack.c.bf16 %v1404_v60, %v1404_v60  ;;  %v2235_v60 = vld [vmem:[%s3420_s3 + $0x8] sm:$0xff] }
 0x3b4   : > { %v1724_v33 = vunpack.c.l.b16 %v1437_v16  ;;  %2009 = vmatpush.bf16.msra.mxu0 %v2235_v60 }
 0x3b5   : > { %v1800_v5 = vpack.c.b16 %v1799_v8, %v1798_v4  ;;  %v1723_v19 = vunpack.c.l.b16 %v1436_v43  ;;  %v2234_v8 = vld [vmem:[%s3420_s3] sm:$0xff] }
 0x3b7   : > { %v1725_v32 = vpack.c.b16 %v1724_v33, %v1723_v19 }
 0x3b8   : > { %2010 = vmatpush.bf16.msra.mxu0 %v2234_v8 }
 0x3b9   : > { %v1802_v38 = vpop.permute.xlu0 %1801 }
 0x3ba   : > { %1814 = vmatpush.bf16.msrb.mxu2 %v1802_v38 }
 0x3bd   : > { %2210 = vmatmul.msk.bf16.vlgmr.msrb.gmra.mxu2 %vm1061_vm2, %v1800_v5 }
 0x3bf   : > { %v1727_v36 = vpop.permute.xlu1 %1726 }
 0x3c0   : > { %1739 = vmatpush.bf16.msra.mxu3 %v1727_v36 }
 0x3c1   : > { %v1827_v49 = vpop.permute.xlu0 %1826 }
 0x3c3   : > { %2207 = vmatmul.msk.bf16.vlgmr.msra.gmra.mxu3 %vm1061_vm2, %v1725_v32 }
 0x3c4   : > { %1839 = vmatpush.bf16.msrb.mxu3 %v1827_v49 }
 0x3cb   : > { %v1591_v13 = vpop.f32.mrf.mxu1 }
 0x3d3   : > { %v1593_v51 = vpop.f32.mrf.mxu1 }
 0x3d4   : > { %v2362_v44 = vpack.i.bf16 %v1593_v51, %v1591_v13 }
 0x3d6   : > { %2363 = vrot.lane.b32.xlu2 %v2362_v44, %s2603_s29 }
 0x3df   : > { %v1346_v59 = vpop.xlane.xlu2 %1345 }
 0x3e0   : > { %2533 = vrcp.f32 %v1346_v59 }
 0x3e6   : > { %v2534_v31 = vpop.eup %2533 }
 0x3e7   : > { %v1412_v37 = vmul.f32 %v2534_v31, %v3282_v3  ;;  %v3335_v3 = vpop.f32.mrf.mxu2 }
 0x3e9   : > { %v1566_v34 = vpop.f32.mrf.mxu0  ;;  %v1444_v41 = vpack.c.bf16 %v1412_v37, %v1412_v37 }
 0x3ea   : > { %v1349_v45 = vpop.xlane.xlu1 %1348 }
 0x3eb   : > { %2535 = vrcp.f32 %v1349_v45  ;;  %v1823_v54 = vunpack.c.l.b16 %v1444_v41 }
 0x3f1   : > { %v2536_v0 = vpop.eup %2535  ;;  %v1568_v18 = vpop.f32.mrf.mxu0 }
 0x3f2   : > { %v1413_v61 = vmul.f32 %v2536_v0, %v3291_v2  ;;  %v2347_v15 = vpack.i.bf16 %v1568_v18, %v1566_v34 }
 0x3f4   : > { %v1445_v63 = vpack.c.bf16 %v1413_v61, %v1413_v61  ;;  %2348 = vrot.lane.b32.xlu0 %v2347_v15, %s2603_s29 }
 0x3f6   : > { %v1824_v53 = vunpack.c.l.b16 %v1445_v63 }
 0x3f7   : > { %v1616_v12 = vpop.f32.mrf.mxu2 }
 0x3f8   : > { %v1825_v27 = vpack.c.b16 %v1824_v53, %v1823_v54 }
 0x3f9   : > { %v1666_v62 = vpop.f32.mrf.mxu0 }
 0x3fa   : > { %2211 = vmatmul.msk.bf16.vlgmr.msrb.gmra.mxu3 %vm1061_vm2, %v1825_v27 }
 0x3ff   : > { %v1618_v10 = vpop.f32.mrf.mxu2 }
 0x400   : > { %v2377_v29 = vpack.i.bf16 %v1618_v10, %v1616_v12 }
 0x401   : > { %v1668_v47 = vpop.f32.mrf.mxu0  ;;  %v1691_v48 = vpop.f32.mrf.mxu1 }
 0x402   : > { %v2352_v6 = vpack.i.bf16 %v1668_v47, %v1666_v62 }
 0x404   : > { %2353 = vrot.lane.b32.xlu0 %v2352_v6, %s2604_s30 }
 0x409   : > { %v1766_v2 = vpop.f32.mrf.mxu0  ;;  %v1693_v28 = vpop.f32.mrf.mxu1 }
 0x40a   : > { %v2367_v11 = vpack.i.bf16 %v1693_v28, %v1691_v48 }
 0x410   : > { %v1641_v56 = vpop.f32.mrf.mxu3 }
 0x411   : > { %v1768_v30 = vpop.f32.mrf.mxu0 }
 0x412   : > { %v2357_v52 = vpack.i.bf16 %v1768_v30, %v1766_v2 }
 0x414   : > { %2358 = vrot.lane.b32.xlu0 %v2357_v52, %s2605_s8 }
 0x417   : > { %v1716_v58 = vpop.f32.mrf.mxu2 }
 0x418   : > { %v1643_v40 = vpop.f32.mrf.mxu3 }
 0x419   : > { %v2392_v25 = vpack.i.bf16 %v1643_v40, %v1641_v56 }
 0x41c   : > { %2368 = vrot.lane.b32.xlu0 %v2367_v11, %s2604_s30 }
 0x41f   : > { %v1718_v42 = vpop.f32.mrf.mxu2 }
 0x420   : > { %v2382_v26 = vpack.i.bf16 %v1718_v42, %v1716_v58 }
 0x424   : > { %2378 = vrot.lane.b32.xlu0 %v2377_v29, %s2603_s29 }
 0x427   : > { %v1791_v50 = vpop.f32.mrf.mxu1 }
 0x42c   : > { %2383 = vrot.lane.b32.xlu0 %v2382_v26, %s2604_s30 }
 0x42f   : > { %v1793_v7 = vpop.f32.mrf.mxu1 }
 0x430   : > { %v2372_v57 = vpack.i.bf16 %v1793_v7, %v1791_v50 }
 0x432   : > { %2373 = vrot.lane.b32.xlu1 %v2372_v57, %s2605_s8 }
 0x434   : > { %2393 = vrot.lane.b32.xlu0 %v2392_v25, %s2603_s29 }
 0x440   : > { %v1816_v21 = vpop.f32.mrf.mxu2 }
 0x446   : > { %v1741_v17 = vpop.f32.mrf.mxu3 }
 0x448   : > { %v1818_v46 = vpop.f32.mrf.mxu2 }
 0x449   : > { %v2387_v14 = vpack.i.bf16 %v1818_v46, %v1816_v21 }
 0x44b   : > { %2388 = vrot.lane.b32.xlu2 %v2387_v14, %s2605_s8 }
 0x44e   : > { %v1743_v1 = vpop.f32.mrf.mxu3 }
 0x44f   : > { %v2397_v20 = vpack.i.bf16 %v1743_v1, %v1741_v17 }
 0x453   : > { %2398 = vrot.lane.b32.xlu2 %v2397_v20, %s2604_s30 }
 0x466   : > { %v2349_v4 = vpop.permute.xlu0 %2348 }
 0x467   : > { %v2351_v43 = vunpack.i.h.bf16 %v2349_v4  ;;  %v2350_v5 = vunpack.i.l.bf16 %v2349_v4 }
 0x469   : > { %v1943_v13 = vsel %vm555_vm1, %v3327_v23, %v2351_v43  ;;  %v1942_v51 = vsel %vm555_vm1, %v3325_v24, %v2350_v5  ;;  %v2364_v23 = vpop.permute.xlu2 %2363 }
 0x46a   : > { %v2366_v41 = vunpack.i.h.bf16 %v2364_v23  ;;  %v2365_v61 = vunpack.i.l.bf16 %v2364_v23 }
 0x46c   : > { %v1945_v53 = vsel %vm555_vm1, %v3321_v22, %v2366_v41  ;;  %v1944_v27 = vsel %vm555_vm1, %v3318_v39, %v2365_v61 }
 0x476   : > { %v2354_v38 = vpop.permute.xlu0 %2353 }
 0x477   : > { %v2356_v33 = vunpack.i.h.bf16 %v2354_v38  ;;  %v2355_v19 = vunpack.i.l.bf16 %v2354_v38 }
 0x479   : > { %v1951_v34 = vsel %vm1061_vm2, %v1943_v13, %v2356_v33  ;;  %v1950_v45 = vsel %vm1061_vm2, %v1942_v51, %v2355_v19 }
 0x47d   : > { %v1841_v16 = vpop.f32.mrf.mxu3 }
 0x485   : > { %v1843_v36 = vpop.f32.mrf.mxu3 }
 0x486   : > { %v2402_v32 = vpack.i.bf16 %v1843_v36, %v1841_v16  ;;  %v2359_v49 = vpop.permute.xlu0 %2358 }
 0x487   : > { %v2361_v44 = vunpack.i.h.bf16 %v2359_v49  ;;  %v2360_v59 = vunpack.i.l.bf16 %v2359_v49 }
 0x488   : > { %2403 = vrot.lane.b32.xlu1 %v2402_v32, %s2605_s8 }
 0x489   : > { %v1960_v31 = vsel %vm1958_vm3, %v1951_v34, %v2361_v44  ;;  %v1959_v37 = vsel %vm1958_vm3, %v1950_v45, %v2360_v59 }
 0x48a   : > { %v1967_v0 = vpack.c.bf16 %v1960_v31, %v1959_v37 }
 0x48c   : > { %2220 = vmatmul.msk.bf16.vlgmr.msra.gmra.mxu0 %vm394_vm0, %v1967_v0 }
 0x48e   : > { %v2369_v18 = vpop.permute.xlu0 %2368 }
 0x48f   : > { %v2371_v24 = vunpack.i.h.bf16 %v2369_v18  ;;  %v2370_v15 = vunpack.i.l.bf16 %v2369_v18 }
 0x491   : > { %v1952_v6 = vsel %vm1061_vm2, %v1944_v27, %v2370_v15  ;;  %v1953_v2 = vsel %vm1061_vm2, %v1945_v53, %v2371_v24 }
 0x496   : > { %v2379_v63 = vpop.permute.xlu0 %2378 }
 0x497   : > { %v2381_v28 = vunpack.i.h.bf16 %v2379_v63  ;;  %v2380_v22 = vunpack.i.l.bf16 %v2379_v63 }
 0x499   : > { %v1947_v56 = vsel %vm555_vm1, %v3335_v3, %v2381_v28  ;;  %v1946_v50 = vsel %vm555_vm1, %v3332_v9, %v2380_v22 }
 0x49e   : > { %v2384_v52 = vpop.permute.xlu0 %2383 }
 0x49f   : > { %v2386_v11 = vunpack.i.h.bf16 %v2384_v52  ;;  %v2385_v58 = vunpack.i.l.bf16 %v2384_v52 }
 0x4a1   : > { %v1954_v42 = vsel %vm1061_vm2, %v1946_v50, %v2385_v58  ;;  %v1955_v26 = vsel %vm1061_vm2, %v1947_v56, %v2386_v11 }
 0x4a4   : > { %v2374_v54 = vpop.permute.xlu1 %2373 }
 0x4a5   : > { %v2376_v62 = vunpack.i.h.bf16 %v2374_v54  ;;  %v2375_v47 = vunpack.i.l.bf16 %v2374_v54  ;;  %v2389_v10 = vpop.permute.xlu2 %2388 }
 0x4a6   : > { %v2391_v39 = vunpack.i.h.bf16 %v2389_v10  ;;  %v2390_v29 = vunpack.i.l.bf16 %v2389_v10  ;;  %v2394_v25 = vpop.permute.xlu0 %2393 }
 0x4a7   : > { %v1961_v12 = vsel %vm1958_vm3, %v1952_v6, %v2375_v47  ;;  %v1962_v48 = vsel %vm1958_vm3, %v1953_v2, %v2376_v62  ;;  %v2396_v17 = vunpack.i.h.bf16 %v2394_v25  ;;  %v2395_v46 = vunpack.i.l.bf16 %v2394_v25 }
 0x4a8   : > { %v1968_v30 = vpack.c.bf16 %v1962_v48, %v1961_v12  ;;  %v1963_v7 = vsel %vm1958_vm3, %v1954_v42, %v2390_v29  ;;  %v1964_v40 = vsel %vm1958_vm3, %v1955_v26, %v2391_v39 }
 0x4a9   : > { %v1969_v57 = vpack.c.bf16 %v1964_v40, %v1963_v7  ;;  %v1949_v9 = vsel %vm555_vm1, %v3342_v55, %v2396_v17  ;;  %v1948_v20 = vsel %vm555_vm1, %v3338_v35, %v2395_v46  ;;  %v2408_v55 = vld [vmem:[%s3421_s4] ss:$0 sm:$0xff] }
 0x4aa   : > { %2221 = vmatmul.msk.bf16.gmra.mxu0 %vm394_vm0, %v1968_v30 }
 0x4ad   : > { %v2399_v21 = vpop.permute.xlu2 %2398 }
 0x4ae   : > { %v2401_v3 = vunpack.i.h.bf16 %v2399_v21  ;;  %v2400_v14 = vunpack.i.l.bf16 %v2399_v21 }
 0x4b0   : > { %v1957_v4 = vsel %vm1061_vm2, %v1949_v9, %v2401_v3  ;;  %v1956_v16 = vsel %vm1061_vm2, %v1948_v20, %v2400_v14 }
 0x4ba   : > { %2222 = vmatmul.msk.bf16.gmra.mxu0 %vm394_vm0, %v1969_v57 }
 0x4fa   : > { %v2404_v1 = vpop.permute.xlu1 %2403 }
 0x4fb   : > { %v2406_v60 = vunpack.i.h.bf16 %v2404_v1  ;;  %v2405_v8 = vunpack.i.l.bf16 %v2404_v1 }
 0x4fd   : > { %v1965_v38 = vsel %vm1958_vm3, %v1956_v16, %v2405_v8  ;;  %v1966_v43 = vsel %vm1958_vm3, %v1957_v4, %v2406_v60 }
 0x4fe   : > { %v1970_v5 = vpack.c.bf16 %v1966_v43, %v1965_v38 }
 0x500   : > { %2223 = vmatmul.msk.bf16.gmra.mxu0 %vm394_vm0, %v1970_v5 }
 0x509   : > { %v2012_v35 = vpop.f32.mrf.mxu0 }
 0x50a   : > { %v2013_v33 = vadd.f32 %v2408_v55, %v2012_v35 }
 0x50c   : > { %2032 = vst.msk [vmem:[%s343_s18] sm:$0xff] %vm394_vm0, %v2013_v33 }
 0x511   : > { %v2014_v19 = vpop.f32.mrf.mxu0 }
 0x512   : > { %v2015_v36 = vadd.f32 %v2408_v55, %v2014_v19 }
 0x514   : > { %2033 = vst.msk [vmem:[%s343_s18 + $0x8] sm:$0xff] %vm394_vm0, %v2015_v36 }
 0x527   : > { %v2017_v32 = vpop.f32.mrf.mxu0 }
 0x528   : > { %v2018_v49 = vadd.f32 %v2408_v55, %v2017_v32 }
 0x52a   : > { %2034 = vst.msk [vmem:[%s343_s18 + $0x10] sm:$0xff] %vm394_vm0, %v2018_v49 }
 0x52f   : > { %v2019_v13 = vpop.f32.mrf.mxu0 }
 0x530   : > { %v2020_v51 = vadd.f32 %v2408_v55, %v2019_v13 }
 0x532   : > { %2035 = vst.msk [vmem:[%s343_s18 + $0x18] sm:$0xff] %vm394_vm0, %v2020_v51 }
 0x537   : > { %v2022_v44 = vpop.f32.mrf.mxu0 }
 0x538   : > { %v2023_v59 = vadd.f32 %v2408_v55, %v2022_v44 }
 0x53a   : > { %2036 = vst.msk [vmem:[%s343_s18 + $0x20] sm:$0xff] %vm394_vm0, %v2023_v59 }
 0x53f   : > { %v2024_v34 = vpop.f32.mrf.mxu0 }
 0x540   : > { %v2025_v45 = vadd.f32 %v2408_v55, %v2024_v34 }
 0x542   : > { %2037 = vst.msk [vmem:[%s343_s18 + $0x28] sm:$0xff] %vm394_vm0, %v2025_v45 }
 0x57d   : > { %v2027_v31 = vpop.f32.mrf.mxu0 }
 0x57e   : > { %v2028_v37 = vadd.f32 %v2408_v55, %v2027_v31 }
 0x580   : > { %2038 = vst.msk [vmem:[%s343_s18 + $0x30] sm:$0xff] %vm394_vm0, %v2028_v37 }
 0x585   : > { %v2029_v0 = vpop.f32.mrf.mxu0 }
 0x586   : > { %v2030_v18 = vadd.f32 %v2408_v55, %v2029_v0 }
 0x588   : > { %2039 = vst.msk [vmem:[%s343_s18 + $0x38] sm:$0xff] %vm394_vm0, %v2030_v18 }
 0x589 PF: > { %s18_s26 = sadd.s32 1, %s2593_s26   ;;  %s3425_s24 = smov %s2589_s25 }
 0x58a   : > { %p15_p8 = scmp.ge.s32.totalorder %s18_s26, 4   ;;  %s3426_s25 = smov %s3428_s28 }
 0x58c   :  { %17 = sbr.rel (!%p15_p8) target bundleno = 2 (0x2), region = 84 }
 0x591   :  { %2070 = vsyncpa [#allocation3], 1 }
 0x592   :  { %2072 = vsyncpa [#allocation3 + $0x1], 1 }

</bundles_post_ra>
